<compile_context>
chip_gen: v7x
topology: tpu7x:2x2x1
jax: 0.10.0
libtpu: 0.0.40
codegen_flags: <defaults>
</compile_context>

<pallas_src>
import functools

import jax
import jax.numpy as jnp
from jax import lax
from jax.experimental import pallas as pl
from jax.experimental.pallas import tpu as pltpu

EPS_IN = 1e-3   # nn.InstanceNorm2d(channels, eps=0.001)
EPS_BN = 1e-5   # nn.BatchNorm2d default eps

_VMEM_LIMIT = 32 * 1024 * 1024         # raised scoped VMEM (safe on v5e/v6e/v7x)
_VMEM_TILE_BUDGET = 20 * 1024 * 1024   # budget for the double-buffered lane-dense tiles


# --------------------------------------------------------------------------- #
# Kernels
# --------------------------------------------------------------------------- #
def stats_kernel(x_ref, st_ref):
    """Per-(b, c) [sum, sum-of-squares] over spatial, accumulated over S tiles.
    Only used for the very first block's input; padded lanes are zero."""
    @pl.when(pl.program_id(1) == 0)
    def _init():
        st_ref[...] = jnp.zeros_like(st_ref)

    x = x_ref[...].astype(jnp.float32)                         # (C, tS)
    st_ref[...] += jnp.concatenate(
        [jnp.sum(x, axis=1, keepdims=True),
         jnp.sum(x * x, axis=1, keepdims=True)], axis=1)       # single (C, 2) RMW


def fused1_kernel(x_ref, sb_ref, w1_ref, h_ref, st_ref, *, tS, S_true, padded):
    """Fused IN+BN+ReLU (one multiply-add) -> conv1 (bias dropped, cancelled by
    the next InstanceNorm) -> write h (optionally bf16); accumulate h's stats
    on the f32 result before the cast."""
    @pl.when(pl.program_id(1) == 0)
    def _init():
        st_ref[...] = jnp.zeros_like(st_ref)

    x = x_ref[...].astype(jnp.float32)                          # (C, tS)
    sb = sb_ref[...]                                            # (C, 2) = [scale|bias]
    z = jnp.maximum(x * sb[:, 0:1] + sb[:, 1:2], 0.0)
    if padded:   # zero padded lanes so h (and its stats) stay exact
        lane = pl.program_id(1) * tS + lax.broadcasted_iota(jnp.int32, (1, tS), 1)
        z = jnp.where(lane < S_true, z, 0.0)
    h = jnp.dot(w1_ref[...], z, preferred_element_type=jnp.float32)
    h_ref[...] = h.astype(h_ref.dtype)
    st_ref[...] += jnp.concatenate(
        [jnp.sum(h, axis=1, keepdims=True),
         jnp.sum(h * h, axis=1, keepdims=True)], axis=1)


def fused2_stats_kernel(h_ref, x_ref, sb_ref, w2_ref, b2_ref, o_ref, st_ref,
                        *, tS, S_true, padded):
    """Fused IN+BN+ReLU -> conv2 + bias -> identity residual, AND accumulate the
    per-(b, c) stats of the output (the next chained block's input), replacing
    that block's standalone stats pass."""
    @pl.when(pl.program_id(1) == 0)
    def _init():
        st_ref[...] = jnp.zeros_like(st_ref)

    h = h_ref[...].astype(jnp.float32)
    sb = sb_ref[...]
    z = jnp.maximum(h * sb[:, 0:1] + sb[:, 1:2], 0.0)
    out = (jnp.dot(w2_ref[...], z, preferred_element_type=jnp.float32)
           + b2_ref[...] + x_ref[...].astype(jnp.float32))
    if padded:   # keep padded lanes exactly zero so downstream stats stay exact
        lane = pl.program_id(1) * tS + lax.broadcasted_iota(jnp.int32, (1, tS), 1)
        out = jnp.where(lane < S_true, out, 0.0)
    o_ref[...] = out
    st_ref[...] += jnp.concatenate(
        [jnp.sum(out, axis=1, keepdims=True),
         jnp.sum(out * out, axis=1, keepdims=True)], axis=1)


def fused2_last_kernel(h_ref, x_ref, sb_ref, w2_ref, b2_ref, o_ref):
    """Last block of the stack: fused IN+BN+ReLU -> conv2 + bias -> residual
    (no stats needed -> fully parallel grid)."""
    h = h_ref[...].astype(jnp.float32)
    sb = sb_ref[...]
    z = jnp.maximum(h * sb[:, 0:1] + sb[:, 1:2], 0.0)
    out = (jnp.dot(w2_ref[...], z, preferred_element_type=jnp.float32)
           + b2_ref[...] + x_ref[...].astype(jnp.float32))
    o_ref[...] = out.astype(o_ref.dtype)


# --------------------------------------------------------------------------- #
# Host-side tiny folding math (operates on (B, C) arrays only)
# --------------------------------------------------------------------------- #
def _fold_norm(stats, S, gamma, beta):
    """Fold InstanceNorm(eps_in) + train-mode BatchNorm(eps_bn, gamma, beta)
    into a per-(b, c) scale / bias: post-IN batch mean is 0 and the batch
    variance is mean_b(var / (var + eps_in)).  NOTE: one-pass f32 variance
    (sumsq/S - mu^2); fine for normalized-scale activations, could lose
    precision for data with |mean| >> std."""
    C = stats.shape[1]
    mu = stats[:, :, 0] / S                                      # (B, C)
    var = jnp.maximum(stats[:, :, 1] / S - mu * mu, 0.0)         # biased (/S)
    istd = lax.rsqrt(var + EPS_IN)
    bvar = jnp.mean(var / (var + EPS_IN), axis=0, keepdims=True)  # (1, C)
    scale = istd * (gamma.reshape(1, C) * lax.rsqrt(bvar + EPS_BN))
    bias = beta.reshape(1, C) - mu * scale
    return jnp.concatenate([scale[:, :, None], bias[:, :, None]], axis=-1)  # (B, C, 2)


def _pick_tile_s(S, C):
    """Largest lane-dense spatial tile whose double-buffered working set fits
    the VMEM budget.  Never falls back to a full-extent S block; non-divisible
    S is padded up to a multiple of the tile (padded lanes are masked in-kernel)."""
    # Heaviest pass (fused2_stats): h bf16 (2B) + x f32 (4B) in, out f32 (4B) out,
    # each double-buffered -> ~20 bytes per (c, s) element.
    max_ts = _VMEM_TILE_BUDGET // (20 * C)
    max_ts = max(128, (max_ts // 128) * 128)
    candidates = [t for t in (4096, 2048, 1024, 512, 256, 128) if t <= max_ts]
    for t in candidates:                       # biggest tile that divides S exactly
        if S % t == 0:
            return t, S
    t = candidates[0]                          # otherwise: pad S up to a multiple
    if S < t:
        t = min(t, max(128, ((S + 127) // 128) * 128))
    S_pad = ((S + t - 1) // t) * t
    return t, S_pad


# --------------------------------------------------------------------------- #
# Forward wrapper (stack of identity-residual PointCN blocks)
# --------------------------------------------------------------------------- #
@functools.partial(jax.jit, static_argnames=("h_dtype",))
def pointcn_stack_forward(x, params_list, h_dtype=jnp.bfloat16):
    """x: (B, C, H, W) float32 NCHW.  params_list: tuple of per-block
    (w1, b1, g1, be1, w2, b2, g2, be2).  Train-mode BatchNorm semantics
    (batch statistics of exactly this call), matching a freshly constructed
    PyTorch module in .train()."""
    B, C, H, W = x.shape
    S = H * W
    tS, S_pad = _pick_tile_s(S, C)
    padded = (S_pad != S)

    x3 = x.reshape(B, C, S).astype(jnp.float32)
    if padded:
        x3 = jnp.pad(x3, ((0, 0), (0, 0), (0, S_pad - S)))
    grid = (B, S_pad // tS)

    x_spec = pl.BlockSpec((None, C, tS), lambda b, s: (b, 0, s))
    st_spec = pl.BlockSpec((None, C, 2), lambda b, s: (b, 0, 0))
    sb_spec = pl.BlockSpec((None, C, 2), lambda b, s: (b, 0, 0))
    w_spec = pl.BlockSpec((C, C), lambda b, s: (0, 0))
    b_spec = pl.BlockSpec((C, 1), lambda b, s: (0, 0))

    cp_reduce = pltpu.CompilerParams(
        dimension_semantics=("parallel", "arbitrary"),
        vmem_limit_bytes=_VMEM_LIMIT)
    cp_parallel = pltpu.CompilerParams(
        dimension_semantics=("parallel", "parallel"),
        vmem_limit_bytes=_VMEM_LIMIT)

    # Standalone stats pass only for the very first block's input; chained
    # blocks get their input stats for free from the previous fused2.
    stats_cur = pl.pallas_call(
        stats_kernel,
        out_shape=jax.ShapeDtypeStruct((B, C, 2), jnp.float32),
        grid=grid,
        in_specs=[x_spec],
        out_specs=st_spec,
        compiler_params=cp_reduce,
    )(x3)

    cur = x3
    n_blocks = len(params_list)
    for i, params in enumerate(params_list):
        w1, b1, g1, be1, w2, b2, g2, be2 = params
        del b1  # exactly cancelled by the following InstanceNorm

        sb1 = _fold_norm(stats_cur, S, g1, be1)                   # (B, C, 2)

        k1 = functools.partial(fused1_kernel, tS=tS, S_true=S, padded=padded)
        h, stats_h = pl.pallas_call(
            k1,
            out_shape=(jax.ShapeDtypeStruct((B, C, S_pad), h_dtype),
                       jax.ShapeDtypeStruct((B, C, 2), jnp.float32)),
            grid=grid,
            in_specs=[x_spec, sb_spec, w_spec],
            out_specs=(x_spec, st_spec),
            compiler_params=cp_reduce,
        )(cur, sb1, w1)

        sb2 = _fold_norm(stats_h, S, g2, be2)

        if i == n_blocks - 1:
            cur = pl.pallas_call(
                fused2_last_kernel,
                out_shape=jax.ShapeDtypeStruct((B, C, S_pad), jnp.float32),
                grid=grid,
                in_specs=[x_spec, x_spec, sb_spec, w_spec, b_spec],
                out_specs=x_spec,
                compiler_params=cp_parallel,
            )(h, cur, sb2, w2, b2)
        else:
            k2 = functools.partial(fused2_stats_kernel, tS=tS, S_true=S, padded=padded)
            cur, stats_cur = pl.pallas_call(
                k2,
                out_shape=(jax.ShapeDtypeStruct((B, C, S_pad), jnp.float32),
                           jax.ShapeDtypeStruct((B, C, 2), jnp.float32)),
                grid=grid,
                in_specs=[x_spec, x_spec, sb_spec, w_spec, b_spec],
                out_specs=(x_spec, st_spec),
                compiler_params=cp_reduce,
            )(h, cur, sb2, w2, b2)

    if padded:
        cur = cur[:, :, :S]
    return cur.reshape(B, C, H, W).astype(x.dtype)


def pointcn_forward(x, params, h_dtype=jnp.bfloat16):
    """Single-block convenience wrapper."""
    return pointcn_stack_forward(x, (params,), h_dtype=h_dtype)


# --------------------------------------------------------------------------- #
# Pure-JAX reference of the PyTorch forward (train-mode BatchNorm)
# --------------------------------------------------------------------------- #
def pointcn_reference(x, params):
    w1, b1, g1, be1, w2, b2, g2, be2 = params
    B, C, H, W = x.shape

    def inorm(t):
        mu = t.mean(axis=(2, 3), keepdims=True)
        var = ((t - mu) ** 2).mean(axis=(2, 3), keepdims=True)
        return (t - mu) * lax.rsqrt(var + EPS_IN)

    def bnorm(t, g, b):
        mu = t.mean(axis=(0, 2, 3), keepdims=True)
        var = ((t - mu) ** 2).mean(axis=(0, 2, 3), keepdims=True)
        return ((t - mu) * lax.rsqrt(var + EPS_BN)
                * g.reshape(1, C, 1, 1) + b.reshape(1, C, 1, 1))

    def conv1x1(t, w, b):
        return jnp.einsum('oc,bchw->bohw', w, t) + b.reshape(1, C, 1, 1)

    h = conv1x1(jnp.maximum(bnorm(inorm(x), g1, be1), 0.0), w1, b1)
    o = conv1x1(jnp.maximum(bnorm(inorm(h), g2, be2), 0.0), w2, b2)
    return o + x


def pointcn_stack_reference(x, params_list):
    for p in params_list:
        x = pointcn_reference(x, p)
    return x


if __name__ == "__main__":
    B, C, H, W = 2, 32, 32, 32     # S = 1024 -> tile 1024, grid (2, 1)
    N_BLOCKS = 2                   # mimics GCABlock's l1_1 stack (layer_num // 2)
    key = jax.random.PRNGKey(0)
    kx, key = jax.random.split(key)
    x = jax.random.normal(kx, (B, C, H, W), jnp.float32)

    # Deterministic synthetic parameters (shapes from the module's __init__):
    #   Conv2d(C, C, 1) weights (C, C, 1, 1) -> stored as (C, C); biases as (C, 1).
    #   BatchNorm2d(C) weight/bias as (C, 1).  InstanceNorm2d has no params.
    params_list = []
    for _ in range(N_BLOCKS):
        ks = jax.random.split(key, 9)
        key = ks[0]
        w1 = 0.1 * jax.random.normal(ks[1], (C, C), jnp.float32)
        b1 = 0.1 * jax.random.normal(ks[2], (C, 1), jnp.float32)
        g1 = 1.0 + 0.1 * jax.random.normal(ks[3], (C, 1), jnp.float32)
        be1 = 0.1 * jax.random.normal(ks[4], (C, 1), jnp.float32)
        w2 = 0.1 * jax.random.normal(ks[5], (C, C), jnp.float32)
        b2 = 0.1 * jax.random.normal(ks[6], (C, 1), jnp.float32)
        g2 = 1.0 + 0.1 * jax.random.normal(ks[7], (C, 1), jnp.float32)
        be2 = 0.1 * jax.random.normal(ks[8], (C, 1), jnp.float32)
        params_list.append((w1, b1, g1, be1, w2, b2, g2, be2))
    params_list = tuple(params_list)

    ref = jax.block_until_ready(pointcn_stack_reference(x, params_list))

    # Exact-precision path (f32 h) validates the algebraic IN+BN+ReLU fold tightly.
    out_f32 = jax.block_until_ready(
        pointcn_stack_forward(x, params_list, h_dtype=jnp.float32))
    assert out_f32.shape == (B, C, H, W) and out_f32.dtype == jnp.float32
    err_f32 = float(jnp.max(jnp.abs(out_f32 - ref)))
    assert err_f32 < 1e-3, f"f32 path mismatch vs reference: max abs err {err_f32}"

    # Fast path: h stored in bf16 (halves the h write + read HBM legs).
    out_bf16 = jax.block_until_ready(
        pointcn_stack_forward(x, params_list, h_dtype=jnp.bfloat16))
    err_bf16 = float(jnp.max(jnp.abs(out_bf16 - ref)))
    assert err_bf16 < 2e-2, f"bf16-h path mismatch vs reference: max abs err {err_bf16}"

    print("KERNEL_OK")
</pallas_src>

<mosaic_0001>
module attributes {stable_mosaic.version = 11 : i64} {
  func.func @stats_kernel(%arg0: i32, %arg1: i32, %arg2: memref<1x32x1024xf32, #tpu.memory_space<vmem>>, %arg3: memref<1x32x2xf32, #tpu.memory_space<vmem>>) attributes {dimension_semantics = [#tpu.dimension_semantics<parallel>, #tpu.dimension_semantics<arbitrary>], iteration_bounds = array<i64: 2, 1>, scalar_prefetch = 0 : i64, scratch_operands = 0 : i64, tpu.core_type = #tpu.core_type<tc>, window_params = [{transform_indices = @transform_0, window_bounds = array<i64: 1, 32, 1024>}, {transform_indices = @transform_1, window_bounds = array<i64: 1, 32, 2>}]} {
    %c0_i32 = arith.constant 0 : i32
    %0 = arith.cmpi eq, %arg1, %c0_i32 : i32
    %1 = arith.extui %0 : i1 to i32
    %c0_i32_0 = arith.constant 0 : i32
    %2 = arith.cmpi ne, %1, %c0_i32_0 : i32
    scf.if %2 {
      %cst_10 = arith.constant 0.000000e+00 : f32
      %17 = vector.broadcast %cst_10 : f32 to vector<32x2xf32>
      %c0_11 = arith.constant 0 : index
      %c0_12 = arith.constant 0 : index
      %c0_13 = arith.constant 0 : index
      %18 = vector.load %arg3[%c0_11, %c0_12, %c0_13] : memref<1x32x2xf32, #tpu.memory_space<vmem>>, vector<1x32x2xf32>
      %19 = vector.shape_cast %18 : vector<1x32x2xf32> to vector<32x2xf32>
      %20 = vector.shape_cast %17 : vector<32x2xf32> to vector<1x32x2xf32>
      tpu.vector_store %arg3[%c0_11, %c0_12, %c0_13], %20 {strides = array<i32>} : memref<1x32x2xf32, #tpu.memory_space<vmem>>, vector<1x32x2xf32>,
    } else {
    }
    %c0 = arith.constant 0 : index
    %c0_1 = arith.constant 0 : index
    %c0_2 = arith.constant 0 : index
    %3 = vector.load %arg2[%c0, %c0_1, %c0_2] : memref<1x32x1024xf32, #tpu.memory_space<vmem>>, vector<1x32x1024xf32>
    %4 = vector.shape_cast %3 : vector<1x32x1024xf32> to vector<32x1024xf32>
    %c0_3 = arith.constant 0 : index
    %c0_4 = arith.constant 0 : index
    %c0_5 = arith.constant 0 : index
    %5 = vector.load %arg3[%c0_3, %c0_4, %c0_5] : memref<1x32x2xf32, #tpu.memory_space<vmem>>, vector<1x32x2xf32>
    %6 = vector.shape_cast %5 : vector<1x32x2xf32> to vector<32x2xf32>
    %cst = arith.constant dense<0.000000e+00> : vector<32xf32>
    %7 = vector.multi_reduction <add>, %4, %cst [1] : vector<32x1024xf32> to vector<32xf32>
    %8 = vector.shape_cast %7 : vector<32xf32> to vector<32x1xf32>
    %9 = arith.mulf %4, %4 : vector<32x1024xf32>
    %cst_6 = arith.constant dense<0.000000e+00> : vector<32xf32>
    %10 = vector.multi_reduction <add>, %9, %cst_6 [1] : vector<32x1024xf32> to vector<32xf32>
    %11 = vector.shape_cast %10 : vector<32xf32> to vector<32x1xf32>
    %12 = tpu.concatenate %8, %11 in 1 : vector<32x1xf32>, vector<32x1xf32> -> vector<32x2xf32>
    %13 = arith.addf %6, %12 : vector<32x2xf32>
    %c0_7 = arith.constant 0 : index
    %c0_8 = arith.constant 0 : index
    %c0_9 = arith.constant 0 : index
    %14 = vector.load %arg3[%c0_7, %c0_8, %c0_9] : memref<1x32x2xf32, #tpu.memory_space<vmem>>, vector<1x32x2xf32>
    %15 = vector.shape_cast %14 : vector<1x32x2xf32> to vector<32x2xf32>
    %16 = vector.shape_cast %13 : vector<32x2xf32> to vector<1x32x2xf32>
    tpu.vector_store %arg3[%c0_7, %c0_8, %c0_9], %16 {strides = array<i32>} : memref<1x32x2xf32, #tpu.memory_space<vmem>>, vector<1x32x2xf32>,
    return
  }
  func.func @transform_0(%arg0: i32, %arg1: i32) -> (i32, i32, i32) {
    %c0_i32 = arith.constant 0 : i32
    %c0_i32_0 = arith.constant 0 : i32
    return %arg0, %c0_i32, %arg1 : i32, i32, i32
  }
  func.func @transform_1(%arg0: i32, %arg1: i32) -> (i32, i32, i32) {
    %c0_i32 = arith.constant 0 : i32
    %c0_i32_0 = arith.constant 0 : i32
    %c0_i32_1 = arith.constant 0 : i32
    return %arg0, %c0_i32, %c0_i32_0 : i32, i32, i32
  }
}

module attributes {stable_mosaic.version = 11 : i64} {
  func.func @fused1_kernel(%arg0: i32, %arg1: i32, %arg2: memref<1x32x1024xf32, #tpu.memory_space<vmem>>, %arg3: memref<1x32x2xf32, #tpu.memory_space<vmem>>, %arg4: memref<32x32xf32, #tpu.memory_space<vmem>>, %arg5: memref<1x32x1024xf32, #tpu.memory_space<vmem>>, %arg6: memref<1x32x2xf32, #tpu.memory_space<vmem>>) attributes {dimension_semantics = [#tpu.dimension_semantics<parallel>, #tpu.dimension_semantics<arbitrary>], iteration_bounds = array<i64: 2, 1>, scalar_prefetch = 0 : i64, scratch_operands = 0 : i64, tpu.core_type = #tpu.core_type<tc>, window_params = [{transform_indices = @transform_0, window_bounds = array<i64: 1, 32, 1024>}, {transform_indices = @transform_1, window_bounds = array<i64: 1, 32, 2>}, {pipeline_mode = #tpu.pipeline_mode<synchronous>, transform_indices = @transform_2, window_bounds = array<i64: 32, 32>}, {transform_indices = @transform_3, window_bounds = array<i64: 1, 32, 1024>}, {transform_indices = @transform_4, window_bounds = array<i64: 1, 32, 2>}]} {
    %c0_i32 = arith.constant 0 : i32
    %0 = arith.cmpi eq, %arg1, %c0_i32 : i32
    %1 = arith.extui %0 : i1 to i32
    %c0_i32_0 = arith.constant 0 : i32
    %2 = arith.cmpi ne, %1, %c0_i32_0 : i32
    scf.if %2 {
      %cst_20 = arith.constant 0.000000e+00 : f32
      %32 = vector.broadcast %cst_20 : f32 to vector<32x2xf32>
      %c0_21 = arith.constant 0 : index
      %c0_22 = arith.constant 0 : index
      %c0_23 = arith.constant 0 : index
      %33 = vector.load %arg6[%c0_21, %c0_22, %c0_23] : memref<1x32x2xf32, #tpu.memory_space<vmem>>, vector<1x32x2xf32>
      %34 = vector.shape_cast %33 : vector<1x32x2xf32> to vector<32x2xf32>
      %35 = vector.shape_cast %32 : vector<32x2xf32> to vector<1x32x2xf32>
      tpu.vector_store %arg6[%c0_21, %c0_22, %c0_23], %35 {strides = array<i32>} : memref<1x32x2xf32, #tpu.memory_space<vmem>>, vector<1x32x2xf32>,
    } else {
    }
    %c0 = arith.constant 0 : index
    %c0_1 = arith.constant 0 : index
    %c0_2 = arith.constant 0 : index
    %3 = vector.load %arg2[%c0, %c0_1, %c0_2] : memref<1x32x1024xf32, #tpu.memory_space<vmem>>, vector<1x32x1024xf32>
    %4 = vector.shape_cast %3 : vector<1x32x1024xf32> to vector<32x1024xf32>
    %c0_3 = arith.constant 0 : index
    %c0_4 = arith.constant 0 : index
    %c0_5 = arith.constant 0 : index
    %5 = vector.load %arg3[%c0_3, %c0_4, %c0_5] : memref<1x32x2xf32, #tpu.memory_space<vmem>>, vector<1x32x2xf32>
    %6 = vector.shape_cast %5 : vector<1x32x2xf32> to vector<32x2xf32>
    %7 = vector.extract_strided_slice %6 {offsets = [0, 0], sizes = [32, 1], strides = [1, 1]} : vector<32x2xf32> to vector<32x1xf32>
    %8 = vector.broadcast %7 : vector<32x1xf32> to vector<32x1024xf32>
    %9 = arith.mulf %4, %8 : vector<32x1024xf32>
    %10 = vector.extract_strided_slice %6 {offsets = [0, 1], sizes = [32, 1], strides = [1, 1]} : vector<32x2xf32> to vector<32x1xf32>
    %11 = vector.broadcast %10 : vector<32x1xf32> to vector<32x1024xf32>
    %12 = arith.addf %9, %11 : vector<32x1024xf32>
    %cst = arith.constant 0.000000e+00 : f32
    %13 = vector.broadcast %cst : f32 to vector<32x1024xf32>
    %14 = arith.maximumf %12, %13 : vector<32x1024xf32>
    %c0_6 = arith.constant 0 : index
    %c0_7 = arith.constant 0 : index
    %15 = vector.load %arg4[%c0_6, %c0_7] : memref<32x32xf32, #tpu.memory_space<vmem>>, vector<32x32xf32>
    %cst_8 = arith.constant dense<0.000000e+00> : vector<32x1024xf32>
    %16 = tpu.matmul %15, %14, %cst_8 {dimension_numbers = #tpu.dot_dimension_numbers<[1], [0], [0], [1], [0, 0, 1, 1], [], []>} : vector<32x32xf32>, vector<32x1024xf32>, vector<32x1024xf32> -> vector<32x1024xf32>
    %c0_9 = arith.constant 0 : index
    %c0_10 = arith.constant 0 : index
    %c0_11 = arith.constant 0 : index
    %17 = vector.load %arg5[%c0_9, %c0_10, %c0_11] : memref<1x32x1024xf32, #tpu.memory_space<vmem>>, vector<1x32x1024xf32>
    %18 = vector.shape_cast %17 : vector<1x32x1024xf32> to vector<32x1024xf32>
    %19 = vector.shape_cast %16 : vector<32x1024xf32> to vector<1x32x1024xf32>
    tpu.vector_store %arg5[%c0_9, %c0_10, %c0_11], %19 {strides = array<i32>} : memref<1x32x1024xf32, #tpu.memory_space<vmem>>, vector<1x32x1024xf32>,
    %c0_12 = arith.constant 0 : index
    %c0_13 = arith.constant 0 : index
    %c0_14 = arith.constant 0 : index
    %20 = vector.load %arg6[%c0_12, %c0_13, %c0_14] : memref<1x32x2xf32, #tpu.memory_space<vmem>>, vector<1x32x2xf32>
    %21 = vector.shape_cast %20 : vector<1x32x2xf32> to vector<32x2xf32>
    %cst_15 = arith.constant dense<0.000000e+00> : vector<32xf32>
    %22 = vector.multi_reduction <add>, %16, %cst_15 [1] : vector<32x1024xf32> to vector<32xf32>
    %23 = vector.shape_cast %22 : vector<32xf32> to vector<32x1xf32>
    %24 = arith.mulf %16, %16 : vector<32x1024xf32>
    %cst_16 = arith.constant dense<0.000000e+00> : vector<32xf32>
    %25 = vector.multi_reduction <add>, %24, %cst_16 [1] : vector<32x1024xf32> to vector<32xf32>
    %26 = vector.shape_cast %25 : vector<32xf32> to vector<32x1xf32>
    %27 = tpu.concatenate %23, %26 in 1 : vector<32x1xf32>, vector<32x1xf32> -> vector<32x2xf32>
    %28 = arith.addf %21, %27 : vector<32x2xf32>
    %c0_17 = arith.constant 0 : index
    %c0_18 = arith.constant 0 : index
    %c0_19 = arith.constant 0 : index
    %29 = vector.load %arg6[%c0_17, %c0_18, %c0_19] : memref<1x32x2xf32, #tpu.memory_space<vmem>>, vector<1x32x2xf32>
    %30 = vector.shape_cast %29 : vector<1x32x2xf32> to vector<32x2xf32>
    %31 = vector.shape_cast %28 : vector<32x2xf32> to vector<1x32x2xf32>
    tpu.vector_store %arg6[%c0_17, %c0_18, %c0_19], %31 {strides = array<i32>} : memref<1x32x2xf32, #tpu.memory_space<vmem>>, vector<1x32x2xf32>,
    return
  }
  func.func @transform_0(%arg0: i32, %arg1: i32) -> (i32, i32, i32) {
    %c0_i32 = arith.constant 0 : i32
    %c0_i32_0 = arith.constant 0 : i32
    return %arg0, %c0_i32, %arg1 : i32, i32, i32
  }
  func.func @transform_1(%arg0: i32, %arg1: i32) -> (i32, i32, i32) {
    %c0_i32 = arith.constant 0 : i32
    %c0_i32_0 = arith.constant 0 : i32
    %c0_i32_1 = arith.constant 0 : i32
    return %arg0, %c0_i32, %c0_i32_0 : i32, i32, i32
  }
  func.func @transform_2(%arg0: i32, %arg1: i32) -> (i32, i32) {
    %c0_i32 = arith.constant 0 : i32
    %c0_i32_0 = arith.constant 0 : i32
    %c0_i32_1 = arith.constant 0 : i32
    return %c0_i32, %c0_i32_0 : i32, i32
  }
  func.func @transform_3(%arg0: i32, %arg1: i32) -> (i32, i32, i32) {
    %c0_i32 = arith.constant 0 : i32
    %c0_i32_0 = arith.constant 0 : i32
    return %arg0, %c0_i32, %arg1 : i32, i32, i32
  }
  func.func @transform_4(%arg0: i32, %arg1: i32) -> (i32, i32, i32) {
    %c0_i32 = arith.constant 0 : i32
    %c0_i32_0 = arith.constant 0 : i32
    %c0_i32_1 = arith.constant 0 : i32
    return %arg0, %c0_i32, %c0_i32_0 : i32, i32, i32
  }
}

module attributes {stable_mosaic.version = 11 : i64} {
  func.func @fused2_stats_kernel(%arg0: i32, %arg1: i32, %arg2: memref<1x32x1024xf32, #tpu.memory_space<vmem>>, %arg3: memref<1x32x1024xf32, #tpu.memory_space<vmem>>, %arg4: memref<1x32x2xf32, #tpu.memory_space<vmem>>, %arg5: memref<32x32xf32, #tpu.memory_space<vmem>>, %arg6: memref<32x1xf32, #tpu.memory_space<vmem>>, %arg7: memref<1x32x1024xf32, #tpu.memory_space<vmem>>, %arg8: memref<1x32x2xf32, #tpu.memory_space<vmem>>) attributes {dimension_semantics = [#tpu.dimension_semantics<parallel>, #tpu.dimension_semantics<arbitrary>], iteration_bounds = array<i64: 2, 1>, scalar_prefetch = 0 : i64, scratch_operands = 0 : i64, tpu.core_type = #tpu.core_type<tc>, window_params = [{transform_indices = @transform_0, window_bounds = array<i64: 1, 32, 1024>}, {transform_indices = @transform_1, window_bounds = array<i64: 1, 32, 1024>}, {transform_indices = @transform_2, window_bounds = array<i64: 1, 32, 2>}, {pipeline_mode = #tpu.pipeline_mode<synchronous>, transform_indices = @transform_3, window_bounds = array<i64: 32, 32>}, {pipeline_mode = #tpu.pipeline_mode<synchronous>, transform_indices = @transform_4, window_bounds = array<i64: 32, 1>}, {transform_indices = @transform_5, window_bounds = array<i64: 1, 32, 1024>}, {transform_indices = @transform_6, window_bounds = array<i64: 1, 32, 2>}]} {
    %c0_i32 = arith.constant 0 : i32
    %0 = arith.cmpi eq, %arg1, %c0_i32 : i32
    %1 = arith.extui %0 : i1 to i32
    %c0_i32_0 = arith.constant 0 : i32
    %2 = arith.cmpi ne, %1, %c0_i32_0 : i32
    scf.if %2 {
      %cst_25 = arith.constant 0.000000e+00 : f32
      %38 = vector.broadcast %cst_25 : f32 to vector<32x2xf32>
      %c0_26 = arith.constant 0 : index
      %c0_27 = arith.constant 0 : index
      %c0_28 = arith.constant 0 : index
      %39 = vector.load %arg8[%c0_26, %c0_27, %c0_28] : memref<1x32x2xf32, #tpu.memory_space<vmem>>, vector<1x32x2xf32>
      %40 = vector.shape_cast %39 : vector<1x32x2xf32> to vector<32x2xf32>
      %41 = vector.shape_cast %38 : vector<32x2xf32> to vector<1x32x2xf32>
      tpu.vector_store %arg8[%c0_26, %c0_27, %c0_28], %41 {strides = array<i32>} : memref<1x32x2xf32, #tpu.memory_space<vmem>>, vector<1x32x2xf32>,
    } else {
    }
    %c0 = arith.constant 0 : index
    %c0_1 = arith.constant 0 : index
    %c0_2 = arith.constant 0 : index
    %3 = vector.load %arg2[%c0, %c0_1, %c0_2] : memref<1x32x1024xf32, #tpu.memory_space<vmem>>, vector<1x32x1024xf32>
    %4 = vector.shape_cast %3 : vector<1x32x1024xf32> to vector<32x1024xf32>
    %c0_3 = arith.constant 0 : index
    %c0_4 = arith.constant 0 : index
    %c0_5 = arith.constant 0 : index
    %5 = vector.load %arg4[%c0_3, %c0_4, %c0_5] : memref<1x32x2xf32, #tpu.memory_space<vmem>>, vector<1x32x2xf32>
    %6 = vector.shape_cast %5 : vector<1x32x2xf32> to vector<32x2xf32>
    %7 = vector.extract_strided_slice %6 {offsets = [0, 0], sizes = [32, 1], strides = [1, 1]} : vector<32x2xf32> to vector<32x1xf32>
    %8 = vector.broadcast %7 : vector<32x1xf32> to vector<32x1024xf32>
    %9 = arith.mulf %4, %8 : vector<32x1024xf32>
    %10 = vector.extract_strided_slice %6 {offsets = [0, 1], sizes = [32, 1], strides = [1, 1]} : vector<32x2xf32> to vector<32x1xf32>
    %11 = vector.broadcast %10 : vector<32x1xf32> to vector<32x1024xf32>
    %12 = arith.addf %9, %11 : vector<32x1024xf32>
    %cst = arith.constant 0.000000e+00 : f32
    %13 = vector.broadcast %cst : f32 to vector<32x1024xf32>
    %14 = arith.maximumf %12, %13 : vector<32x1024xf32>
    %c0_6 = arith.constant 0 : index
    %c0_7 = arith.constant 0 : index
    %15 = vector.load %arg5[%c0_6, %c0_7] : memref<32x32xf32, #tpu.memory_space<vmem>>, vector<32x32xf32>
    %cst_8 = arith.constant dense<0.000000e+00> : vector<32x1024xf32>
    %16 = tpu.matmul %15, %14, %cst_8 {dimension_numbers = #tpu.dot_dimension_numbers<[1], [0], [0], [1], [0, 0, 1, 1], [], []>} : vector<32x32xf32>, vector<32x1024xf32>, vector<32x1024xf32> -> vector<32x1024xf32>
    %c0_9 = arith.constant 0 : index
    %c0_10 = arith.constant 0 : index
    %17 = vector.load %arg6[%c0_9, %c0_10] : memref<32x1xf32, #tpu.memory_space<vmem>>, vector<32x1xf32>
    %18 = vector.broadcast %17 : vector<32x1xf32> to vector<32x1024xf32>
    %19 = arith.addf %16, %18 : vector<32x1024xf32>
    %c0_11 = arith.constant 0 : index
    %c0_12 = arith.constant 0 : index
    %c0_13 = arith.constant 0 : index
    %20 = vector.load %arg3[%c0_11, %c0_12, %c0_13] : memref<1x32x1024xf32, #tpu.memory_space<vmem>>, vector<1x32x1024xf32>
    %21 = vector.shape_cast %20 : vector<1x32x1024xf32> to vector<32x1024xf32>
    %22 = arith.addf %19, %21 : vector<32x1024xf32>
    %c0_14 = arith.constant 0 : index
    %c0_15 = arith.constant 0 : index
    %c0_16 = arith.constant 0 : index
    %23 = vector.load %arg7[%c0_14, %c0_15, %c0_16] : memref<1x32x1024xf32, #tpu.memory_space<vmem>>, vector<1x32x1024xf32>
    %24 = vector.shape_cast %23 : vector<1x32x1024xf32> to vector<32x1024xf32>
    %25 = vector.shape_cast %22 : vector<32x1024xf32> to vector<1x32x1024xf32>
    tpu.vector_store %arg7[%c0_14, %c0_15, %c0_16], %25 {strides = array<i32>} : memref<1x32x1024xf32, #tpu.memory_space<vmem>>, vector<1x32x1024xf32>,
    %c0_17 = arith.constant 0 : index
    %c0_18 = arith.constant 0 : index
    %c0_19 = arith.constant 0 : index
    %26 = vector.load %arg8[%c0_17, %c0_18, %c0_19] : memref<1x32x2xf32, #tpu.memory_space<vmem>>, vector<1x32x2xf32>
    %27 = vector.shape_cast %26 : vector<1x32x2xf32> to vector<32x2xf32>
    %cst_20 = arith.constant dense<0.000000e+00> : vector<32xf32>
    %28 = vector.multi_reduction <add>, %22, %cst_20 [1] : vector<32x1024xf32> to vector<32xf32>
    %29 = vector.shape_cast %28 : vector<32xf32> to vector<32x1xf32>
    %30 = arith.mulf %22, %22 : vector<32x1024xf32>
    %cst_21 = arith.constant dense<0.000000e+00> : vector<32xf32>
    %31 = vector.multi_reduction <add>, %30, %cst_21 [1] : vector<32x1024xf32> to vector<32xf32>
    %32 = vector.shape_cast %31 : vector<32xf32> to vector<32x1xf32>
    %33 = tpu.concatenate %29, %32 in 1 : vector<32x1xf32>, vector<32x1xf32> -> vector<32x2xf32>
    %34 = arith.addf %27, %33 : vector<32x2xf32>
    %c0_22 = arith.constant 0 : index
    %c0_23 = arith.constant 0 : index
    %c0_24 = arith.constant 0 : index
    %35 = vector.load %arg8[%c0_22, %c0_23, %c0_24] : memref<1x32x2xf32, #tpu.memory_space<vmem>>, vector<1x32x2xf32>
    %36 = vector.shape_cast %35 : vector<1x32x2xf32> to vector<32x2xf32>
    %37 = vector.shape_cast %34 : vector<32x2xf32> to vector<1x32x2xf32>
    tpu.vector_store %arg8[%c0_22, %c0_23, %c0_24], %37 {strides = array<i32>} : memref<1x32x2xf32, #tpu.memory_space<vmem>>, vector<1x32x2xf32>,
    return
  }
  func.func @transform_0(%arg0: i32, %arg1: i32) -> (i32, i32, i32) {
    %c0_i32 = arith.constant 0 : i32
    %c0_i32_0 = arith.constant 0 : i32
    return %arg0, %c0_i32, %arg1 : i32, i32, i32
  }
  func.func @transform_1(%arg0: i32, %arg1: i32) -> (i32, i32, i32) {
    %c0_i32 = arith.constant 0 : i32
    %c0_i32_0 = arith.constant 0 : i32
    return %arg0, %c0_i32, %arg1 : i32, i32, i32
  }
  func.func @transform_2(%arg0: i32, %arg1: i32) -> (i32, i32, i32) {
    %c0_i32 = arith.constant 0 : i32
    %c0_i32_0 = arith.constant 0 : i32
    %c0_i32_1 = arith.constant 0 : i32
    return %arg0, %c0_i32, %c0_i32_0 : i32, i32, i32
  }
  func.func @transform_3(%arg0: i32, %arg1: i32) -> (i32, i32) {
    %c0_i32 = arith.constant 0 : i32
    %c0_i32_0 = arith.constant 0 : i32
    %c0_i32_1 = arith.constant 0 : i32
    return %c0_i32, %c0_i32_0 : i32, i32
  }
  func.func @transform_4(%arg0: i32, %arg1: i32) -> (i32, i32) {
    %c0_i32 = arith.constant 0 : i32
    %c0_i32_0 = arith.constant 0 : i32
    %c0_i32_1 = arith.constant 0 : i32
    return %c0_i32, %c0_i32_0 : i32, i32
  }
  func.func @transform_5(%arg0: i32, %arg1: i32) -> (i32, i32, i32) {
    %c0_i32 = arith.constant 0 : i32
    %c0_i32_0 = arith.constant 0 : i32
    return %arg0, %c0_i32, %arg1 : i32, i32, i32
  }
  func.func @transform_6(%arg0: i32, %arg1: i32) -> (i32, i32, i32) {
    %c0_i32 = arith.constant 0 : i32
    %c0_i32_0 = arith.constant 0 : i32
    %c0_i32_1 = arith.constant 0 : i32
    return %arg0, %c0_i32, %c0_i32_0 : i32, i32, i32
  }
}

module attributes {stable_mosaic.version = 11 : i64} {
  func.func @fused2_last_kernel(%arg0: i32, %arg1: i32, %arg2: memref<1x32x1024xf32, #tpu.memory_space<vmem>>, %arg3: memref<1x32x1024xf32, #tpu.memory_space<vmem>>, %arg4: memref<1x32x2xf32, #tpu.memory_space<vmem>>, %arg5: memref<32x32xf32, #tpu.memory_space<vmem>>, %arg6: memref<32x1xf32, #tpu.memory_space<vmem>>, %arg7: memref<1x32x1024xf32, #tpu.memory_space<vmem>>) attributes {dimension_semantics = [#tpu.dimension_semantics<parallel>, #tpu.dimension_semantics<parallel>], iteration_bounds = array<i64: 2, 1>, scalar_prefetch = 0 : i64, scratch_operands = 0 : i64, tpu.core_type = #tpu.core_type<tc>, window_params = [{transform_indices = @transform_0, window_bounds = array<i64: 1, 32, 1024>}, {transform_indices = @transform_1, window_bounds = array<i64: 1, 32, 1024>}, {transform_indices = @transform_2, window_bounds = array<i64: 1, 32, 2>}, {pipeline_mode = #tpu.pipeline_mode<synchronous>, transform_indices = @transform_3, window_bounds = array<i64: 32, 32>}, {pipeline_mode = #tpu.pipeline_mode<synchronous>, transform_indices = @transform_4, window_bounds = array<i64: 32, 1>}, {transform_indices = @transform_5, window_bounds = array<i64: 1, 32, 1024>}]} {
    %c0 = arith.constant 0 : index
    %c0_0 = arith.constant 0 : index
    %c0_1 = arith.constant 0 : index
    %0 = vector.load %arg2[%c0, %c0_0, %c0_1] : memref<1x32x1024xf32, #tpu.memory_space<vmem>>, vector<1x32x1024xf32>
    %1 = vector.shape_cast %0 : vector<1x32x1024xf32> to vector<32x1024xf32>
    %c0_2 = arith.constant 0 : index
    %c0_3 = arith.constant 0 : index
    %c0_4 = arith.constant 0 : index
    %2 = vector.load %arg4[%c0_2, %c0_3, %c0_4] : memref<1x32x2xf32, #tpu.memory_space<vmem>>, vector<1x32x2xf32>
    %3 = vector.shape_cast %2 : vector<1x32x2xf32> to vector<32x2xf32>
    %4 = vector.extract_strided_slice %3 {offsets = [0, 0], sizes = [32, 1], strides = [1, 1]} : vector<32x2xf32> to vector<32x1xf32>
    %5 = vector.broadcast %4 : vector<32x1xf32> to vector<32x1024xf32>
    %6 = arith.mulf %1, %5 : vector<32x1024xf32>
    %7 = vector.extract_strided_slice %3 {offsets = [0, 1], sizes = [32, 1], strides = [1, 1]} : vector<32x2xf32> to vector<32x1xf32>
    %8 = vector.broadcast %7 : vector<32x1xf32> to vector<32x1024xf32>
    %9 = arith.addf %6, %8 : vector<32x1024xf32>
    %cst = arith.constant 0.000000e+00 : f32
    %10 = vector.broadcast %cst : f32 to vector<32x1024xf32>
    %11 = arith.maximumf %9, %10 : vector<32x1024xf32>
    %c0_5 = arith.constant 0 : index
    %c0_6 = arith.constant 0 : index
    %12 = vector.load %arg5[%c0_5, %c0_6] : memref<32x32xf32, #tpu.memory_space<vmem>>, vector<32x32xf32>
    %cst_7 = arith.constant dense<0.000000e+00> : vector<32x1024xf32>
    %13 = tpu.matmul %12, %11, %cst_7 {dimension_numbers = #tpu.dot_dimension_numbers<[1], [0], [0], [1], [0, 0, 1, 1], [], []>} : vector<32x32xf32>, vector<32x1024xf32>, vector<32x1024xf32> -> vector<32x1024xf32>
    %c0_8 = arith.constant 0 : index
    %c0_9 = arith.constant 0 : index
    %14 = vector.load %arg6[%c0_8, %c0_9] : memref<32x1xf32, #tpu.memory_space<vmem>>, vector<32x1xf32>
    %15 = vector.broadcast %14 : vector<32x1xf32> to vector<32x1024xf32>
    %16 = arith.addf %13, %15 : vector<32x1024xf32>
    %c0_10 = arith.constant 0 : index
    %c0_11 = arith.constant 0 : index
    %c0_12 = arith.constant 0 : index
    %17 = vector.load %arg3[%c0_10, %c0_11, %c0_12] : memref<1x32x1024xf32, #tpu.memory_space<vmem>>, vector<1x32x1024xf32>
    %18 = vector.shape_cast %17 : vector<1x32x1024xf32> to vector<32x1024xf32>
    %19 = arith.addf %16, %18 : vector<32x1024xf32>
    %c0_13 = arith.constant 0 : index
    %c0_14 = arith.constant 0 : index
    %c0_15 = arith.constant 0 : index
    %20 = vector.load %arg7[%c0_13, %c0_14, %c0_15] : memref<1x32x1024xf32, #tpu.memory_space<vmem>>, vector<1x32x1024xf32>
    %21 = vector.shape_cast %20 : vector<1x32x1024xf32> to vector<32x1024xf32>
    %22 = vector.shape_cast %19 : vector<32x1024xf32> to vector<1x32x1024xf32>
    tpu.vector_store %arg7[%c0_13, %c0_14, %c0_15], %22 {strides = array<i32>} : memref<1x32x1024xf32, #tpu.memory_space<vmem>>, vector<1x32x1024xf32>,
    return
  }
  func.func @transform_0(%arg0: i32, %arg1: i32) -> (i32, i32, i32) {
    %c0_i32 = arith.constant 0 : i32
    %c0_i32_0 = arith.constant 0 : i32
    return %arg0, %c0_i32, %arg1 : i32, i32, i32
  }
  func.func @transform_1(%arg0: i32, %arg1: i32) -> (i32, i32, i32) {
    %c0_i32 = arith.constant 0 : i32
    %c0_i32_0 = arith.constant 0 : i32
    return %arg0, %c0_i32, %arg1 : i32, i32, i32
  }
  func.func @transform_2(%arg0: i32, %arg1: i32) -> (i32, i32, i32) {
    %c0_i32 = arith.constant 0 : i32
    %c0_i32_0 = arith.constant 0 : i32
    %c0_i32_1 = arith.constant 0 : i32
    return %arg0, %c0_i32, %c0_i32_0 : i32, i32, i32
  }
  func.func @transform_3(%arg0: i32, %arg1: i32) -> (i32, i32) {
    %c0_i32 = arith.constant 0 : i32
    %c0_i32_0 = arith.constant 0 : i32
    %c0_i32_1 = arith.constant 0 : i32
    return %c0_i32, %c0_i32_0 : i32, i32
  }
  func.func @transform_4(%arg0: i32, %arg1: i32) -> (i32, i32) {
    %c0_i32 = arith.constant 0 : i32
    %c0_i32_0 = arith.constant 0 : i32
    %c0_i32_1 = arith.constant 0 : i32
    return %c0_i32, %c0_i32_0 : i32, i32
  }
  func.func @transform_5(%arg0: i32, %arg1: i32) -> (i32, i32, i32) {
    %c0_i32 = arith.constant 0 : i32
    %c0_i32_0 = arith.constant 0 : i32
    return %arg0, %c0_i32, %arg1 : i32, i32, i32
  }
}

</mosaic_0001>

<bundles_post_ra>
// kernel: pointcn_stack_forward.5
= control target key start
LH: loop header
LB: loop body
LE: loop exit
PB: predicated region body
PF: predicated region fallthrough
CT: control target
= control target key end

     0   :  { %s450_s6 = smov 0   ;;  %s452_s7 = smov 0   ;;  %s577_s0 = inlined_call_operand.vmem [shape: f32[2,32,1024], index: 0, kind: input, shape index: {}]   ;;  %s578_s1 = inlined_call_operand.vmem [shape: f32[2,32,2], index: 1, kind: output, shape index: {}]  }
   0x1   :  { %s454_s8 = smov 0  }
   0x2 LB: > { %s23_s9 = sadd.s32 1, %s433_s7  ;;  %p381_p0 = scmp.ge.s32.totalorder %s437_s8, 1  ;;  %s437_s8 = sphi %s454_s8, %s11_s8   ;;  %s433_s7 = sphi %s452_s7, %s580_s7   ;;  %s429_s6 = sphi %s450_s6, %s579_s6  }
   0x3   : > { %p25_p1 = scmp.ge.s32.totalorder %s23_s9, 2  ;;  %p106_p2 = scmp.lt.s32.totalorder %s437_s8, 3 }
   0x5   : > { %s582_s9 = smov (%p25_p1, %s23_s9), 0  ;;  %p107_p3 = pnand %p381_p0, %p106_p2 }
   0x6   : > { %p131_p4 = scmp.lt.s32.totalorder (!%p107_p3), %s429_s6, 1  ;;  %vm149_vm0 = vcmask (!%p107_p3), 15360   ;;  %vm294_vm1 = vcmask (!%p107_p3), 7168  }
   0x7   : > { %110 = sbr.rel (%p107_p3) target bundleno = 192 (0xc0), region = 24 }
   0xe   : > { %s584_s6 = smov (!%p131_p4, %s429_s6), 1 }
   0xf   : > { %s388_s10 = sshll.u32 %s584_s6, 8  ;;  %s389_s14 = sshll.u32 %s584_s6, 5 }
  0x10   : > { %s474_s13 = scalar_lea.vmem %s577_s0, %s388_s10  ;;  %s542_s17 = scalar_lea.vmem %s578_s1, %s389_s14 }
  0x11   : > { %v170_v0 = vld [vmem:[%s474_s13 + $0x80] sm:$0xff]  ;;  %v171_v1 = vld [vmem:[%s474_s13 + $0x88] sm:$0xff]  ;;  %v172_v2 = vld [vmem:[%s474_s13 + $0x90] sm:$0xff] }
  0x12   : > { %v208_v3 = vadd.f32 %v171_v1, %v170_v0  ;;  %v173_v4 = vld [vmem:[%s474_s13 + $0x98] sm:$0xff]  ;;  %v154_v5 = vld [vmem:[%s474_s13] sm:$0xff]  ;;  %v155_v7 = vld [vmem:[%s474_s13 + $0x8] sm:$0xff]  ;;  %v484_v15 = vmul.f32 %v170_v0, %v170_v0  ;;  %v486_v16 = vmul.f32 %v171_v1, %v171_v1  ;;  %v488_v17 = vmul.f32 %v172_v2, %v172_v2 }
  0x13   : > { %v156_v8 = vld [vmem:[%s474_s13 + $0x10] sm:$0xff]  ;;  %v226_v9 = vmul.f32 %v154_v5, %v154_v5  ;;  %v174_v10 = vld [vmem:[%s474_s13 + $0xa0] sm:$0xff]  ;;  %v190_v11 = vadd.f32 %v155_v7, %v154_v5  ;;  %v227_v12 = vmul.f32 %v155_v7, %v155_v7  ;;  %v157_v18 = vld [vmem:[%s474_s13 + $0x18] sm:$0xff]  ;;  %v496_v22 = vmul.f32 %v173_v4, %v173_v4 }
  0x14   : > { %v209_v6 = vadd.f32 %v208_v3, %v172_v2  ;;  %v228_v13 = vmul.f32 %v156_v8, %v156_v8  ;;  %v178_v19 = vld [vmem:[%s474_s13 + $0xc0] sm:$0xff]  ;;  %v179_v20 = vld [vmem:[%s474_s13 + $0xc8] sm:$0xff]  ;;  %v180_v25 = vld [vmem:[%s474_s13 + $0xd0] sm:$0xff]  ;;  %v503_v30 = vmul.f32 %v174_v10, %v174_v10  ;;  %v229_v32 = vmul.f32 %v157_v18, %v157_v18 }
  0x15   : > { %v494_v21 = vld [vmem:[%s474_s13 + $0xa8] sm:$0xff]  ;;  %v158_v23 = vld [vmem:[%s474_s13 + $0x20] sm:$0xff]  ;;  %v191_v24 = vadd.f32 %v190_v11, %v156_v8  ;;  %v217_v26 = vadd.f32 %v179_v20, %v178_v19  ;;  %v258_v27 = vadd.f32 %v227_v12, %v226_v9  ;;  %v501_v28 = vld [vmem:[%s474_s13 + $0xb0] sm:$0xff]  ;;  %v250_v59 = vmul.f32 %v178_v19, %v178_v19 }
  0x16   : > { %v210_v14 = vadd.f32 %v209_v6, %v173_v4  ;;  %v159_v31 = vld [vmem:[%s474_s13 + $0x28] sm:$0xff]  ;;  %v230_v33 = vmul.f32 %v158_v23, %v158_v23  ;;  %v181_v34 = vld [vmem:[%s474_s13 + $0xd8] sm:$0xff]  ;;  %v162_v38 = vld [vmem:[%s474_s13 + $0x40] sm:$0xff]  ;;  %v251_v0 = vmul.f32 %v179_v20, %v179_v20  ;;  %v252_v9 = vmul.f32 %v180_v25, %v180_v25 }
  0x17   : > { %v192_v35 = vadd.f32 %v191_v24, %v157_v18  ;;  %v231_v36 = vmul.f32 %v159_v31, %v159_v31  ;;  %v218_v37 = vadd.f32 %v217_v26, %v180_v25  ;;  %v163_v39 = vld [vmem:[%s474_s13 + $0x48] sm:$0xff]  ;;  %v164_v40 = vld [vmem:[%s474_s13 + $0x50] sm:$0xff]  ;;  %v259_v41 = vadd.f32 %v258_v27, %v228_v13  ;;  %v161_v44 = vld [vmem:[%s474_s13 + $0x38] sm:$0xff] }
  0x18   : > { %v211_v29 = vadd.f32 %v210_v14, %v174_v10  ;;  %v160_v43 = vld [vmem:[%s474_s13 + $0x30] sm:$0xff]  ;;  %v182_v45 = vld [vmem:[%s474_s13 + $0xe0] sm:$0xff]  ;;  %v199_v46 = vadd.f32 %v163_v39, %v162_v38  ;;  %v234_v47 = vmul.f32 %v162_v38, %v162_v38  ;;  %v235_v48 = vmul.f32 %v163_v39, %v163_v39  ;;  %v515_v49 = vld [vmem:[%s474_s13 + $0xb8] sm:$0xff] }
  0x19   : > { %v193_v50 = vadd.f32 %v192_v35, %v158_v23  ;;  %v232_v51 = vmul.f32 %v160_v43, %v160_v43  ;;  %v233_v52 = vmul.f32 %v161_v44, %v161_v44  ;;  %v219_v53 = vadd.f32 %v218_v37, %v181_v34  ;;  %v165_v54 = vld [vmem:[%s474_s13 + $0x58] sm:$0xff]  ;;  %v183_v56 = vld [vmem:[%s474_s13 + $0xe8] sm:$0xff]  ;;  %v166_v62 = vld [vmem:[%s474_s13 + $0x60] sm:$0xff] }
  0x1a   : > { %v212_v42 = vadd.f32 %v211_v29, %v494_v21  ;;  %v200_v57 = vadd.f32 %v199_v46, %v164_v40  ;;  %v236_v58 = vmul.f32 %v164_v40, %v164_v40  ;;  %v237_v63 = vmul.f32 %v165_v54, %v165_v54  ;;  %v184_v2 = vld [vmem:[%s474_s13 + $0xf0] sm:$0xff]  ;;  %v167_v8 = vld [vmem:[%s474_s13 + $0x68] sm:$0xff]  ;;  %v185_v11 = vld [vmem:[%s474_s13 + $0xf8] sm:$0xff] }
  0x1b   : > { %v194_v60 = vadd.f32 %v193_v50, %v159_v31  ;;  %v220_v61 = vadd.f32 %v219_v53, %v182_v45  ;;  %v267_v4 = vadd.f32 %v235_v48, %v234_v47  ;;  %v260_v5 = vadd.f32 %v259_v41, %v229_v32  ;;  %v168_v23 = vld [vmem:[%s474_s13 + $0x70] sm:$0xff] }
  0x1c   : > { %v213_v55 = vadd.f32 %v212_v42, %v501_v28  ;;  %v201_v3 = vadd.f32 %v200_v57, %v165_v54  ;;  %v253_v10 = vmul.f32 %v181_v34, %v181_v34  ;;  %v238_v13 = vmul.f32 %v166_v62, %v166_v62  ;;  %v169_v34 = vld [vmem:[%s474_s13 + $0x78] sm:$0xff] }
  0x1d   : > { %v195_v6 = vadd.f32 %v194_v60, %v160_v43  ;;  %v221_v7 = vadd.f32 %v220_v61, %v183_v56  ;;  %v268_v14 = vadd.f32 %v267_v4, %v236_v58  ;;  %v261_v18 = vadd.f32 %v260_v5, %v230_v33 }
  0x1e   : > { %v214_v1 = vadd.f32 %v213_v55, %v515_v49  ;;  %v202_v12 = vadd.f32 %v201_v3, %v166_v62  ;;  %v239_v24 = vmul.f32 %v167_v8, %v167_v8  ;;  %v285_v26 = vadd.f32 %v251_v0, %v250_v59 }
  0x1f   : > { %v196_v19 = vadd.f32 %v195_v6, %v161_v44  ;;  %v222_v20 = vadd.f32 %v221_v7, %v184_v2  ;;  %v269_v29 = vadd.f32 %v268_v14, %v237_v63  ;;  %v262_v31 = vadd.f32 %v261_v18, %v231_v36 }
  0x20   : > { %215 = vadd.xlane.f32.xlu1 %v214_v1  ;;  %v203_v27 = vadd.f32 %v202_v12, %v167_v8  ;;  %v276_v32 = vadd.f32 %v486_v16, %v484_v15  ;;  %v240_v35 = vmul.f32 %v168_v23, %v168_v23  ;;  %v254_v37 = vmul.f32 %v182_v45, %v182_v45 }
  0x21   : > { %197 = vadd.xlane.f32.xlu0 %v196_v19  ;;  %v223_v25 = vadd.f32 %v222_v20, %v185_v11  ;;  %v286_v38 = vadd.f32 %v285_v26, %v252_v9  ;;  %v270_v40 = vadd.f32 %v269_v29, %v238_v13  ;;  %v263_v33 = vadd.f32 %v262_v31, %v232_v51 }
  0x22   : > { %v204_v39 = vadd.f32 %v203_v27, %v168_v23  ;;  %v277_v41 = vadd.f32 %v276_v32, %v488_v17  ;;  %v247_v42 = vmul.f32 %v494_v21, %v494_v21  ;;  %v255_v43 = vmul.f32 %v183_v56, %v183_v56 }
  0x23   : > { %v287_v36 = vadd.f32 %v286_v38, %v253_v10  ;;  %v241_v46 = vmul.f32 %v169_v34, %v169_v34  ;;  %v271_v15 = vadd.f32 %v270_v40, %v239_v24  ;;  %v256_v47 = vmul.f32 %v184_v2, %v184_v2 }
  0x24   : > { %224 = vadd.xlane.f32.xlu1 %v223_v25  ;;  %v205_v44 = vadd.f32 %v204_v39, %v169_v34  ;;  %v278_v16 = vadd.f32 %v277_v41, %v496_v22  ;;  %v248_v45 = vmul.f32 %v501_v28, %v501_v28  ;;  %v264_v17 = vadd.f32 %v263_v33, %v233_v52 }
  0x25   : > { %v288_v48 = vadd.f32 %v287_v36, %v254_v37  ;;  %v272_v50 = vadd.f32 %v271_v15, %v240_v35  ;;  %v257_v21 = vmul.f32 %v185_v11, %v185_v11  ;;  %v249_v54 = vmul.f32 %v515_v49, %v515_v49 }
  0x26   : > { %206 = vadd.xlane.f32.xlu0 %v205_v44  ;;  %v279_v51 = vadd.f32 %v278_v16, %v503_v30  ;;  %v439_v28 = vmov 0.0  }
  0x27   : > { %v289_v53 = vadd.f32 %v288_v48, %v255_v43  ;;  %v273_v55 = vadd.f32 %v272_v50, %v241_v46  ;;  %151 = vst.msk [vmem:[%s542_s17 + $0x8] sm:$0xff] %vm149_vm0, %v439_v28  ;;  %150 = vst.msk [vmem:[%s542_s17] sm:$0xff] %vm149_vm0, %v439_v28 }
  0x28   : > { %v280_v56 = vadd.f32 %v279_v51, %v247_v42  ;;  %152 = vst.msk [vmem:[%s542_s17 + $0x10] sm:$0xff] %vm149_vm0, %v439_v28  ;;  %153 = vst.msk [vmem:[%s542_s17 + $0x18] sm:$0xff] %vm149_vm0, %v439_v28 }
  0x29   : > { %v290_v57 = vadd.f32 %v289_v53, %v256_v47  ;;  %274 = vadd.xlane.f32.xlu1 %v273_v55 }
  0x2a   : > { %265 = vadd.xlane.f32.xlu0 %v264_v17  ;;  %v281_v22 = vadd.f32 %v280_v56, %v248_v45 }
  0x2b   : > { %v291_v58 = vadd.f32 %v290_v57, %v257_v21 }
  0x2c   : > { %v282_v59 = vadd.f32 %v281_v22, %v249_v54 }
  0x2d   : > { %292 = vadd.xlane.f32.xlu1 %v291_v58 }
  0x2e   : > { %283 = vadd.xlane.f32.xlu0 %v282_v59  ;;  %v187_v61 = vld [vmem:[%s542_s17 + $0x8] sm:$0xff]  ;;  %v186_v62 = vld [vmem:[%s542_s17] sm:$0xff] }
  0x2f   : > { %v189_v5 = vld [vmem:[%s542_s17 + $0x18] sm:$0xff]  ;;  %v188_v6 = vld [vmem:[%s542_s17 + $0x10] sm:$0xff] }
  0xad   : > { %v216_v30 = vpop.xlane.xlu1 %215 }
  0xae   : > { %v198_v49 = vpop.xlane.xlu0 %197 }
  0xb1   : > { %v225_v52 = vpop.xlane.xlu1 %224 }
  0xb3   : > { %v207_v60 = vpop.xlane.xlu0 %206 }
  0xb6   : > { %v275_v63 = vpop.xlane.xlu1 %274 }
  0xb7   : > { %v266_v0 = vpop.xlane.xlu0 %265  ;;  %v296_v1 = vsel %vm294_vm1, %v207_v60, %v275_v63 }
  0xb8   : > { %v295_v2 = vsel %vm294_vm1, %v198_v49, %v266_v0  ;;  %v300_v3 = vadd.f32 %v296_v1, %v187_v61 }
  0xb9   : > { %v299_v4 = vadd.f32 %v295_v2, %v186_v62 }
  0xba   : > { %305 = vst.msk [vmem:[%s542_s17 + $0x8] sm:$0xff] %vm149_vm0, %v300_v3  ;;  %v293_v7 = vpop.xlane.xlu1 %292 }
  0xbb   : > { %304 = vst.msk [vmem:[%s542_s17] sm:$0xff] %vm149_vm0, %v299_v4  ;;  %v284_v8 = vpop.xlane.xlu0 %283  ;;  %v298_v9 = vsel %vm294_vm1, %v225_v52, %v293_v7 }
  0xbc   : > { %v297_v10 = vsel %vm294_vm1, %v216_v30, %v284_v8  ;;  %v302_v11 = vadd.f32 %v298_v9, %v189_v5 }
  0xbd   : > { %v301_v12 = vadd.f32 %v297_v10, %v188_v6 }
  0xbe   : > { %307 = vst.msk [vmem:[%s542_s17 + $0x18] sm:$0xff] %vm149_vm0, %v302_v11 }
  0xbf   : > { %306 = vst.msk [vmem:[%s542_s17 + $0x10] sm:$0xff] %vm149_vm0, %v301_v12 }
  0xc0 PF: > { %s11_s8 = sadd.s32 1, %s437_s8   ;;  %s579_s6 = smov %s433_s7 }
  0xc1   : > { %p8_p5 = scmp.ge.s32.totalorder %s11_s8, 4   ;;  %s580_s7 = smov %s582_s9 }
  0xc3   :  { %10 = sbr.rel (!%p8_p5) target bundleno = 2 (0x2), region = 58 }

// kernel: pointcn_stack_forward.6
= control target key start
LH: loop header
LB: loop body
LE: loop exit
PB: predicated region body
PF: predicated region fallthrough
CT: control target
= control target key end

     0   :  { %s1257_s15 = smov 0   ;;  %s1259_s16 = smov 0   ;;  %s1522_s0 = inlined_call_operand.vmem [shape: f32[2,32,1024], index: 0, kind: input, shape index: {}]   ;;  %s1523_s1 = inlined_call_operand.vmem [shape: f32[2,32,2], index: 1, kind: input, shape index: {}]   ;;  %s1524_s2 = inlined_call_operand.vmem [shape: f32[32,32], index: 2, kind: input, shape index: {}]   ;;  %s1525_s3 = inlined_call_operand.vmem [shape: f32[2,32,1024], index: 3, kind: output, shape index: {0}]   ;;  %s1526_s4 = inlined_call_operand.vmem [shape: f32[2,32,2], index: 4, kind: output, shape index: {1}]  }
   0x1   :  { %s1261_s17 = smov 0  }
   0x2 LB: > { %s27_s18 = sadd.s32 1, %s1223_s16  ;;  %p1110_p0 = scmp.ge.s32.totalorder %s1227_s17, 1  ;;  %s1227_s17 = sphi %s1261_s17, %s15_s17   ;;  %s1223_s16 = sphi %s1259_s16, %s1528_s16   ;;  %s1219_s15 = sphi %s1257_s15, %s1527_s15  }
   0x3   : > { %p29_p1 = scmp.ge.s32.totalorder %s27_s18, 2  ;;  %p196_p2 = scmp.lt.s32.totalorder %s1227_s17, 3 }
   0x5   : > { %s1530_s18 = smov (%p29_p1, %s27_s18), 0  ;;  %p197_p3 = pnand %p1110_p0, %p196_p2 }
   0x6   : > { %p241_p4 = scmp.lt.s32.totalorder (!%p197_p3), %s1219_s15, 1  ;;  %v1229_v0 = vmov (!%p197_p3), 1   ;;  %v1230_v1 = vmov (!%p197_p3), 0   ;;  %v1231_v6 = vmov (!%p197_p3), 0.0   ;;  %vm451_vm0 = vcmask (!%p197_p3), 261120  }
   0x7   : > { %200 = sbr.rel (%p197_p3) target bundleno = 568 (0x238), region = 32  ;;  %1201 = vset.pattern.permute.xlu1 (!%p197_p3), %v1229_v0  ;;  %1200 = vset.pattern.permute.xlu0 (!%p197_p3), %v1230_v1  ;;  %vm274_vm1 = vcmask (!%p197_p3), 15360   ;;  %vm960_vm2 = vcmask (!%p197_p3), 7168  }
   0x8   : > { %528 = vmatprep.mubr.f32.mxu0 (!%p197_p3), %v1231_v6  ;;  %617 = vmatprep.mubr.f32.mxu1 (!%p197_p3), %v1231_v6 }
   0xe   : > { %s1532_s15 = smov (!%p241_p4, %s1219_s15), 1 }
   0xf   : > { %s1138_s19 = sshll.u32 %s1532_s15, 5  ;;  %s1137_s23 = sshll.u32 %s1532_s15, 8 }
  0x10   : > { %s254_s22 = scalar_lea.vmem %s1523_s1, %s1138_s19  ;;  %s1291_s26 = scalar_lea.vmem %s1522_s0, %s1137_s23 }
  0x11   : > { %v311_v2 = vld [vmem:[%s254_s22] sm:$0xff]  ;;  %v312_v3 = vld [vmem:[%s254_s22 + $0x8] sm:$0xff]  ;;  %v313_v4 = vld [vmem:[%s254_s22 + $0x10] sm:$0xff]  ;;  %s1444_s11 = scalar_lea.vmem %s1525_s3, %s1137_s23  ;;  %s1483_s14 = scalar_lea.vmem %s1526_s4, %s1138_s19 }
  0x12   : > { %368 = vperm.xlu1 %1201, %v311_v2   ;;  %317 = vperm.xlu0 %1200, %v311_v2   ;;  %v314_v5 = vld [vmem:[%s254_s22 + $0x18] sm:$0xff]  ;;  %v280_v7 = vld [vmem:[%s1291_s26 + $0x8] sm:$0xff]  ;;  %v279_v9 = vld [vmem:[%s1291_s26] sm:$0xff]  ;;  %275 = vst.msk [vmem:[%s1483_s14] sm:$0xff] %vm274_vm1, %v1231_v6 }
  0x13   : > { %v282_v8 = vld [vmem:[%s1291_s26 + $0x18] sm:$0xff]  ;;  %v281_v10 = vld [vmem:[%s1291_s26 + $0x10] sm:$0xff]  ;;  %v284_v11 = vld [vmem:[%s1291_s26 + $0x28] sm:$0xff]  ;;  %276 = vst.msk [vmem:[%s1483_s14 + $0x8] sm:$0xff] %vm274_vm1, %v1231_v6 }
  0x14   : > { %v286_v12 = vld [vmem:[%s1291_s26 + $0x38] sm:$0xff]  ;;  %v283_v13 = vld [vmem:[%s1291_s26 + $0x20] sm:$0xff]  ;;  %v285_v14 = vld [vmem:[%s1291_s26 + $0x30] sm:$0xff]  ;;  %277 = vst.msk [vmem:[%s1483_s14 + $0x10] sm:$0xff] %vm274_vm1, %v1231_v6 }
  0x15   : > { %v288_v21 = vld [vmem:[%s1291_s26 + $0x48] sm:$0xff]  ;;  %v290_v22 = vld [vmem:[%s1291_s26 + $0x58] sm:$0xff]  ;;  %v287_v29 = vld [vmem:[%s1291_s26 + $0x40] sm:$0xff]  ;;  %278 = vst.msk [vmem:[%s1483_s14 + $0x18] sm:$0xff] %vm274_vm1, %v1231_v6 }
  0x16   : > { %372 = vperm.xlu1 %1201, %v312_v3   ;;  %322 = vperm.xlu0 %1200, %v312_v3   ;;  %v289_v31 = vld [vmem:[%s1291_s26 + $0x50] sm:$0xff]  ;;  %v292_v35 = vld [vmem:[%s1291_s26 + $0x68] sm:$0xff]  ;;  %v294_v42 = vld [vmem:[%s1291_s26 + $0x78] sm:$0xff] }
  0x17   : > { %v296_v48 = vld [vmem:[%s1291_s26 + $0x88] sm:$0xff]  ;;  %v298_v49 = vld [vmem:[%s1291_s26 + $0x98] sm:$0xff]  ;;  %v295_v59 = vld [vmem:[%s1291_s26 + $0x80] sm:$0xff] }
  0x18   : > { %v304_v53 = vld [vmem:[%s1291_s26 + $0xc8] sm:$0xff]  ;;  %v306_v54 = vld [vmem:[%s1291_s26 + $0xd8] sm:$0xff]  ;;  %v303_v60 = vld [vmem:[%s1291_s26 + $0xc0] sm:$0xff] }
  0x1a   : > { %1202 = vset.pattern.permute.xlu1 %v1230_v1  ;;  %327 = vperm.xlu0 %1200, %v313_v4  }
  0x1b   : > { %332 = vperm.xlu1 %1202, %v314_v5  }
  0x1e   : > { %1203 = vset.pattern.permute.xlu0 %v1229_v0 }
  0x1f   : > { %1204 = vset.pattern.permute.xlu1 %v1229_v0  ;;  %376 = vperm.xlu0 %1203, %v313_v4   ;;  %v297_v4 = vld [vmem:[%s1291_s26 + $0x90] sm:$0xff] }
  0x20   : > { %380 = vperm.xlu1 %1204, %v314_v5   ;;  %v305_v5 = vld [vmem:[%s1291_s26 + $0xd0] sm:$0xff] }
  0x91   : > { %v369_v15 = vpop.permute.xlu1 %368  ;;  %v318_v16 = vpop.permute.xlu0 %317 }
  0x92   : > { %v336_v17 = vmul.f32 %v318_v16, %v280_v7  ;;  %v338_v18 = vmul.f32 %v318_v16, %v282_v8  ;;  %v335_v19 = vmul.f32 %v318_v16, %v279_v9  ;;  %v337_v20 = vmul.f32 %v318_v16, %v281_v10 }
  0x93   : > { %v340_v23 = vmul.f32 %v318_v16, %v284_v11  ;;  %v342_v24 = vmul.f32 %v318_v16, %v286_v12  ;;  %v339_v25 = vmul.f32 %v318_v16, %v283_v13  ;;  %v341_v26 = vmul.f32 %v318_v16, %v285_v14  ;;  %v291_v11 = vld [vmem:[%s1291_s26 + $0x60] sm:$0xff] }
  0x94   : > { %v384_v27 = vadd.f32 %v369_v15, %v336_v17  ;;  %v386_v28 = vadd.f32 %v369_v15, %v338_v18  ;;  %v383_v30 = vadd.f32 %v369_v15, %v335_v19  ;;  %v385_v32 = vadd.f32 %v369_v15, %v337_v20 }
  0x95   : > { %v1305_v33 = vpop.permute.xlu1 %372  ;;  %v1307_v34 = vpop.permute.xlu0 %322  ;;  %v1310_v36 = vadd.f32 %v369_v15, %v340_v23  ;;  %v1312_v37 = vadd.f32 %v369_v15, %v342_v24  ;;  %v1314_v38 = vadd.f32 %v369_v15, %v339_v25  ;;  %v1319_v43 = vadd.f32 %v369_v15, %v341_v26 }
  0x96   : > { %v344_v39 = vmul.f32 %v1307_v34, %v288_v21  ;;  %v416_v40 = vmax.f32 %v384_v27, 0.0  ;;  %v346_v41 = vmul.f32 %v1307_v34, %v290_v22  ;;  %v418_v44 = vmax.f32 %v386_v28, 0.0 }
  0x97   : > { %v343_v45 = vmul.f32 %v1307_v34, %v287_v29  ;;  %v415_v46 = vmax.f32 %v383_v30, 0.0  ;;  %v345_v47 = vmul.f32 %v1307_v34, %v289_v31  ;;  %v417_v52 = vmax.f32 %v385_v32, 0.0 }
  0x98   : > { %v392_v50 = vadd.f32 %v1305_v33, %v344_v39  ;;  %v394_v51 = vadd.f32 %v1305_v33, %v346_v41  ;;  %v348_v55 = vmul.f32 %v1307_v34, %v292_v35  ;;  %v420_v61 = vmax.f32 %v1310_v36, 0.0  ;;  %v293_v41 = vld [vmem:[%s1291_s26 + $0x70] sm:$0xff] }
  0x99   : > { %v1330_v56 = vpop.permute.xlu0 %327  ;;  %v391_v57 = vadd.f32 %v1305_v33, %v343_v45  ;;  %v393_v58 = vadd.f32 %v1305_v33, %v345_v47  ;;  %v350_v62 = vmul.f32 %v1307_v34, %v294_v42  ;;  %v422_v23 = vmax.f32 %v1312_v37, 0.0 }
  0x9a   : > { %v1338_v63 = vpop.permute.xlu1 %332  ;;  %v424_v0 = vmax.f32 %v392_v50, 0.0  ;;  %v426_v1 = vmax.f32 %v394_v51, 0.0  ;;  %v352_v2 = vmul.f32 %v1330_v56, %v296_v48  ;;  %v354_v3 = vmul.f32 %v1330_v56, %v298_v49  ;;  %v300_v50 = vld [vmem:[%s1291_s26 + $0xa8] sm:$0xff] }
  0x9b   : > { %v423_v7 = vmax.f32 %v391_v57, 0.0  ;;  %v425_v8 = vmax.f32 %v393_v58, 0.0  ;;  %v360_v9 = vmul.f32 %v1338_v63, %v304_v53  ;;  %v362_v10 = vmul.f32 %v1338_v63, %v306_v54  ;;  %v308_v51 = vld [vmem:[%s1291_s26 + $0xe8] sm:$0xff]  ;;  %v302_v57 = vld [vmem:[%s1291_s26 + $0xb8] sm:$0xff] }
  0x9c   : > { %v1141_v12 = vpack.c.bf16 %v424_v0, %v416_v40  ;;  %v1149_v13 = vpack.c.bf16 %v426_v1, %v418_v44  ;;  %v351_v14 = vmul.f32 %v1330_v56, %v295_v59  ;;  %v359_v15 = vmul.f32 %v1338_v63, %v303_v60  ;;  %v310_v58 = vld [vmem:[%s1291_s26 + $0xf8] sm:$0xff]  ;;  %v299_v1 = vld [vmem:[%s1291_s26 + $0xa0] sm:$0xff] }
  0x9d   : > { %v1143_v16 = vpack.c.bf16 %v423_v7, %v415_v46  ;;  %v1151_v17 = vpack.c.bf16 %v425_v8, %v417_v52  ;;  %v353_v18 = vmul.f32 %v1330_v56, %v297_v4  ;;  %v361_v19 = vmul.f32 %v1338_v63, %v305_v5  ;;  %v307_v5 = vld [vmem:[%s1291_s26 + $0xe0] sm:$0xff]  ;;  %v301_v7 = vld [vmem:[%s1291_s26 + $0xb0] sm:$0xff] }
  0x9e   : > { %v1351_v20 = vpop.permute.xlu0 %376  ;;  %1142 = vmatprep.subr.bf16.mxu0 %v1141_v12  ;;  %1150 = vmatprep.subr.bf16.mxu1 %v1149_v13  ;;  %v396_v21 = vadd.f32 %v1305_v33, %v348_v55  ;;  %v398_v22 = vadd.f32 %v1305_v33, %v350_v62  ;;  %v347_v24 = vmul.f32 %v1307_v34, %v291_v11  ;;  %v419_v29 = vmax.f32 %v1314_v38, 0.0 }
  0x9f   : > { %v1357_v25 = vpop.permute.xlu1 %380  ;;  %1144 = vmatpush1.bf16.msra.mxu0 %v1143_v16  ;;  %1152 = vmatpush1.bf16.msra.mxu1 %v1151_v17  ;;  %v400_v26 = vadd.f32 %v1351_v20, %v352_v2  ;;  %v402_v27 = vadd.f32 %v1351_v20, %v354_v3  ;;  %v399_v28 = vadd.f32 %v1351_v20, %v351_v14  ;;  %v421_v8 = vmax.f32 %v1319_v43, 0.0  ;;  %v309_v14 = vld [vmem:[%s1291_s26 + $0xf0] sm:$0xff] }
  0xa0   : > { %v408_v30 = vadd.f32 %v1357_v25, %v360_v9  ;;  %v410_v31 = vadd.f32 %v1357_v25, %v362_v10  ;;  %v407_v32 = vadd.f32 %v1357_v25, %v359_v15  ;;  %v401_v35 = vadd.f32 %v1351_v20, %v353_v18 }
  0xa1   : > { %v432_v36 = vmax.f32 %v400_v26, 0.0  ;;  %v434_v37 = vmax.f32 %v402_v27, 0.0  ;;  %v431_v39 = vmax.f32 %v399_v28, 0.0  ;;  %v409_v40 = vadd.f32 %v1357_v25, %v361_v19  ;;  %v448_v26 = vld [vmem:[%s1524_s2 + $0x8] sm:$0xff] }
  0xa2   : > { %v440_v42 = vmax.f32 %v408_v30, 0.0  ;;  %v442_v38 = vmax.f32 %v410_v31, 0.0  ;;  %v439_v44 = vmax.f32 %v407_v32, 0.0  ;;  %v433_v45 = vmax.f32 %v401_v35, 0.0 }
  0xa3   : > { %v441_v46 = vmax.f32 %v409_v40, 0.0  ;;  %v428_v47 = vmax.f32 %v396_v21, 0.0  ;;  %v430_v48 = vmax.f32 %v398_v22, 0.0  ;;  %v395_v49 = vadd.f32 %v1305_v33, %v347_v24 }
  0xa4   : > { %v1145_v52 = vpack.c.bf16 %v440_v42, %v432_v36  ;;  %v1153_v53 = vpack.c.bf16 %v442_v38, %v434_v37  ;;  %v1147_v54 = vpack.c.bf16 %v439_v44, %v431_v39  ;;  %v349_v55 = vmul.f32 %v1307_v34, %v293_v41  ;;  %v447_v34 = vld [vmem:[%s1524_s2] sm:$0xff] }
  0xa5   : > { %v1155_v59 = vpack.c.bf16 %v441_v46, %v433_v45  ;;  %v1157_v60 = vpack.c.bf16 %v428_v47, %v420_v61  ;;  %v1165_v62 = vpack.c.bf16 %v430_v48, %v422_v23  ;;  %v427_v0 = vmax.f32 %v395_v49, 0.0 }
  0xa6   : > { %1146 = vmatprep.subr.bf16.mxu0 %v1145_v52  ;;  %1154 = vmatprep.subr.bf16.mxu1 %v1153_v53  ;;  %v397_v2 = vadd.f32 %v1305_v33, %v349_v55  ;;  %v356_v3 = vmul.f32 %v1330_v56, %v300_v50  ;;  %v364_v4 = vmul.f32 %v1338_v63, %v308_v51 }
  0xa7   : > { %1148 = vmatpush1.bf16.msra.mxu0 %v1147_v54  ;;  %1156 = vmatpush1.bf16.msra.mxu1 %v1155_v59  ;;  %v1159_v61 = vpack.c.bf16 %v427_v0, %v419_v29  ;;  %v358_v9 = vmul.f32 %v1330_v56, %v302_v57  ;;  %v366_v33 = vmul.f32 %v1338_v63, %v310_v58 }
  0xa8   : > { %1158 = vmatprep.subr.bf16.mxu0 %v1157_v60  ;;  %1166 = vmatprep.subr.bf16.mxu1 %v1165_v62  ;;  %v429_v10 = vmax.f32 %v397_v2, 0.0  ;;  %v404_v11 = vadd.f32 %v1351_v20, %v356_v3  ;;  %v412_v12 = vadd.f32 %v1357_v25, %v364_v4  ;;  %v355_v13 = vmul.f32 %v1330_v56, %v299_v1 }
  0xa9   : > { %v406_v15 = vadd.f32 %v1351_v20, %v358_v9  ;;  %v414_v16 = vadd.f32 %v1357_v25, %v366_v33  ;;  %v363_v43 = vmul.f32 %v1338_v63, %v307_v5  ;;  %v357_v17 = vmul.f32 %v1330_v56, %v301_v7 }
  0xaa   : > { %1119 = vmatmul.mubr.msk.f32.vlgmr.msra.gmra.mrb[0].mxu0 %vm451_vm0, %v447_v34  ;;  %1123 = vmatmul.mubr.msk.f32.vlgmr.msra.gmra.mrb[0].mxu1 %vm451_vm0, %v447_v34  ;;  %v1167_v18 = vpack.c.bf16 %v429_v10, %v421_v8  ;;  %v436_v19 = vmax.f32 %v404_v11, 0.0  ;;  %v444_v21 = vmax.f32 %v412_v12, 0.0  ;;  %v403_v22 = vadd.f32 %v1351_v20, %v355_v13 }
  0xab   : > { %1160 = vmatpush1.bf16.msra.mxu0 %v1159_v61  ;;  %v438_v23 = vmax.f32 %v406_v15, 0.0  ;;  %v446_v24 = vmax.f32 %v414_v16, 0.0  ;;  %534 = vmatprep.mubr.f32.mxu0 %v1231_v6  ;;  %v411_v56 = vadd.f32 %v1357_v25, %v363_v43  ;;  %v365_v27 = vmul.f32 %v1338_v63, %v309_v14  ;;  %v449_v63 = vld [vmem:[%s1524_s2 + $0x10] sm:$0xff] }
  0xac   : > { %1168 = vmatpush1.bf16.msra.mxu1 %v1167_v18  ;;  %v1161_v28 = vpack.c.bf16 %v444_v21, %v436_v19  ;;  %v435_v29 = vmax.f32 %v403_v22, 0.0  ;;  %v405_v30 = vadd.f32 %v1351_v20, %v357_v17  ;;  %623 = vmatprep.mubr.f32.mxu1 %v1231_v6 }
  0xad   : > { %v1169_v31 = vpack.c.bf16 %v446_v24, %v438_v23  ;;  %v443_v32 = vmax.f32 %v411_v56, 0.0  ;;  %v413_v35 = vadd.f32 %v1357_v25, %v365_v27  ;;  %v450_v25 = vld [vmem:[%s1524_s2 + $0x18] sm:$0xff] }
  0xae   : > { %1162 = vmatprep.subr.bf16.mxu0 %v1161_v28  ;;  %1120 = vmatmul.mubr.msk.f32.gmra.mrb[2].mxu0 %vm451_vm0, %v448_v26  ;;  %v437_v36 = vmax.f32 %v405_v30, 0.0 }
  0xaf   : > { %1170 = vmatprep.subr.bf16.mxu1 %v1169_v31  ;;  %v1163_v37 = vpack.c.bf16 %v443_v32, %v435_v29  ;;  %v445_v39 = vmax.f32 %v413_v35, 0.0  ;;  %540 = vmatprep.mubr.f32.mxu0 %v1231_v6 }
  0xb0   : > { %1124 = vmatmul.mubr.msk.f32.gmra.mrb[2].mxu1 %vm451_vm0, %v448_v26 }
  0xb1   : > { %1164 = vmatpush1.bf16.msra.mxu0 %v1163_v37  ;;  %v1171_v20 = vpack.c.bf16 %v445_v39, %v437_v36  ;;  %629 = vmatprep.mubr.f32.mxu1 %v1231_v6 }
  0xb2   : > { %1121 = vmatmul.mubr.msk.f32.gmra.mrb[4].mxu0 %vm451_vm0, %v449_v63 }
  0xb3   : > { %1172 = vmatpush1.bf16.msra.mxu1 %v1171_v20  ;;  %546 = vmatprep.mubr.f32.mxu0 %v1231_v6 }
  0xb4   : > { %1125 = vmatmul.mubr.msk.f32.gmra.mrb[4].mxu1 %vm451_vm0, %v449_v63 }
  0xb5   : > { %635 = vmatprep.mubr.f32.mxu1 %v1231_v6 }
  0xb6   : > { %1122 = vmatmul.mubr.msk.f32.gmra.mrb[6].mxu0 %vm451_vm0, %v450_v25 }
  0xb7   : > { %706 = vmatprep.mubr.f32.mxu0 %v1231_v6 }
  0xb8   : > { %1126 = vmatmul.mubr.msk.f32.gmra.mrb[6].mxu1 %vm451_vm0, %v450_v25 }
  0xb9   : > { %795 = vmatprep.mubr.f32.mxu1 %v1231_v6 }
  0xba   : > { %1127 = vmatmul.mubr.msk.f32.vlgmr.msra.gmra.mrb[8].mxu0 %vm451_vm0, %v447_v34 }
  0xbb   : > { %712 = vmatprep.mubr.f32.mxu0 %v1231_v6 }
  0xbc   : > { %1131 = vmatmul.mubr.msk.f32.vlgmr.msra.gmra.mrb[8].mxu1 %vm451_vm0, %v447_v34 }
  0xbd   : > { %801 = vmatprep.mubr.f32.mxu1 %v1231_v6 }
  0xbe   : > { %1128 = vmatmul.mubr.msk.f32.gmra.mrb[10].mxu0 %vm451_vm0, %v448_v26 }
  0xbf   : > { %718 = vmatprep.mubr.f32.mxu0 %v1231_v6 }
  0xc0   : > { %1132 = vmatmul.mubr.msk.f32.gmra.mrb[10].mxu1 %vm451_vm0, %v448_v26 }
  0xc1   : > { %807 = vmatprep.mubr.f32.mxu1 %v1231_v6 }
  0xc2   : > { %1129 = vmatmul.mubr.msk.f32.gmra.mrb[12].mxu0 %vm451_vm0, %v449_v63 }
  0xc3   : > { %724 = vmatprep.mubr.f32.mxu0 %v1231_v6 }
  0xc4   : > { %1133 = vmatmul.mubr.msk.f32.gmra.mrb[12].mxu1 %vm451_vm0, %v449_v63 }
  0xc5   : > { %813 = vmatprep.mubr.f32.mxu1 %v1231_v6 }
  0xc6   : > { %1130 = vmatmul.mubr.msk.f32.gmra.mrb[14].mxu0 %vm451_vm0, %v450_v25 }
  0xc8   : > { %1134 = vmatmul.mubr.msk.f32.gmra.mrb[14].mxu1 %vm451_vm0, %v450_v25 }
 0x17d   : > { %v530_v40 = vpop.f32.mrb[0].mxu0  ;;  %v619_v41 = vpop.f32.mrb[0].mxu1 }
 0x17e   : > { %820 = vst [vmem:[%s1444_s11] sm:$0xff] %v530_v40  ;;  %v892_v42 = vmul.f32 %v530_v40, %v530_v40  ;;  %v532_v38 = vpop.f32.mrb[1].mxu0  ;;  %822 = vst [vmem:[%s1444_s11 + $0x10] sm:$0xff] %v619_v41  ;;  %v621_v44 = vpop.f32.mrb[1].mxu1  ;;  %v894_v47 = vmul.f32 %v619_v41, %v619_v41 }
 0x17f   : > { %821 = vst [vmem:[%s1444_s11 + $0x8] sm:$0xff] %v532_v38  ;;  %v856_v45 = vadd.f32 %v532_v38, %v530_v40  ;;  %v893_v46 = vmul.f32 %v532_v38, %v532_v38  ;;  %823 = vst [vmem:[%s1444_s11 + $0x18] sm:$0xff] %v621_v44  ;;  %v895_v51 = vmul.f32 %v621_v44, %v621_v44 }
 0x181   : > { %v924_v48 = vadd.f32 %v893_v46, %v892_v42  ;;  %v857_v49 = vadd.f32 %v856_v45, %v619_v41  ;;  %v536_v50 = vpop.f32.mrb[2].mxu0 }
 0x182   : > { %828 = vst [vmem:[%s1444_s11 + $0x40] sm:$0xff] %v536_v50  ;;  %v900_v52 = vmul.f32 %v536_v50, %v536_v50  ;;  %v538_v53 = vpop.f32.mrb[3].mxu0 }
 0x183   : > { %v925_v54 = vadd.f32 %v924_v48, %v894_v47  ;;  %829 = vst [vmem:[%s1444_s11 + $0x48] sm:$0xff] %v538_v53  ;;  %v865_v55 = vadd.f32 %v538_v53, %v536_v50  ;;  %v901_v57 = vmul.f32 %v538_v53, %v538_v53  ;;  %v858_v58 = vadd.f32 %v857_v49, %v621_v44  ;;  %v625_v59 = vpop.f32.mrb[2].mxu1 }
 0x184   : > { %830 = vst [vmem:[%s1444_s11 + $0x50] sm:$0xff] %v625_v59  ;;  %v902_v60 = vmul.f32 %v625_v59, %v625_v59  ;;  %v627_v62 = vpop.f32.mrb[3].mxu1 }
 0x185   : > { %v933_v0 = vadd.f32 %v901_v57, %v900_v52  ;;  %v926_v1 = vadd.f32 %v925_v54, %v895_v51  ;;  %v866_v2 = vadd.f32 %v865_v55, %v625_v59  ;;  %v542_v3 = vpop.f32.mrb[4].mxu0  ;;  %831 = vst [vmem:[%s1444_s11 + $0x58] sm:$0xff] %v627_v62  ;;  %v903_v4 = vmul.f32 %v627_v62, %v627_v62 }
 0x186   : > { %836 = vst [vmem:[%s1444_s11 + $0x80] sm:$0xff] %v542_v3  ;;  %v908_v5 = vmul.f32 %v542_v3, %v542_v3  ;;  %v544_v7 = vpop.f32.mrb[5].mxu0 }
 0x187   : > { %v934_v34 = vadd.f32 %v933_v0, %v902_v60  ;;  %837 = vst [vmem:[%s1444_s11 + $0x88] sm:$0xff] %v544_v7  ;;  %v874_v61 = vadd.f32 %v544_v7, %v542_v3  ;;  %v909_v8 = vmul.f32 %v544_v7, %v544_v7  ;;  %v867_v9 = vadd.f32 %v866_v2, %v627_v62  ;;  %v631_v33 = vpop.f32.mrb[4].mxu1 }
 0x188   : > { %838 = vst [vmem:[%s1444_s11 + $0x90] sm:$0xff] %v631_v33  ;;  %v910_v10 = vmul.f32 %v631_v33, %v631_v33  ;;  %v633_v11 = vpop.f32.mrb[5].mxu1 }
 0x189   : > { %v942_v12 = vadd.f32 %v909_v8, %v908_v5  ;;  %v935_v13 = vadd.f32 %v934_v34, %v903_v4  ;;  %v875_v14 = vadd.f32 %v874_v61, %v631_v33  ;;  %v548_v15 = vpop.f32.mrb[6].mxu0  ;;  %839 = vst [vmem:[%s1444_s11 + $0x98] sm:$0xff] %v633_v11  ;;  %v911_v16 = vmul.f32 %v633_v11, %v633_v11 }
 0x18a   : > { %844 = vst [vmem:[%s1444_s11 + $0xc0] sm:$0xff] %v548_v15  ;;  %v916_v43 = vmul.f32 %v548_v15, %v548_v15  ;;  %v550_v17 = vpop.f32.mrb[7].mxu0 }
 0x18b   : > { %v943_v18 = vadd.f32 %v942_v12, %v910_v10  ;;  %845 = vst [vmem:[%s1444_s11 + $0xc8] sm:$0xff] %v550_v17  ;;  %v883_v19 = vadd.f32 %v550_v17, %v548_v15  ;;  %v917_v21 = vmul.f32 %v550_v17, %v550_v17  ;;  %v876_v22 = vadd.f32 %v875_v14, %v633_v11  ;;  %v637_v23 = vpop.f32.mrb[6].mxu1 }
 0x18c   : > { %846 = vst [vmem:[%s1444_s11 + $0xd0] sm:$0xff] %v637_v23  ;;  %v918_v24 = vmul.f32 %v637_v23, %v637_v23  ;;  %v639_v26 = vpop.f32.mrb[7].mxu1 }
 0x18d   : > { %v951_v56 = vadd.f32 %v917_v21, %v916_v43  ;;  %v944_v27 = vadd.f32 %v943_v18, %v911_v16  ;;  %v884_v28 = vadd.f32 %v883_v19, %v637_v23  ;;  %v708_v29 = vpop.f32.mrb[8].mxu0  ;;  %847 = vst [vmem:[%s1444_s11 + $0xd8] sm:$0xff] %v639_v26  ;;  %v919_v30 = vmul.f32 %v639_v26, %v639_v26 }
 0x18e   : > { %824 = vst [vmem:[%s1444_s11 + $0x20] sm:$0xff] %v708_v29  ;;  %v859_v31 = vadd.f32 %v858_v58, %v708_v29  ;;  %v896_v32 = vmul.f32 %v708_v29, %v708_v29  ;;  %v710_v35 = vpop.f32.mrb[9].mxu0 }
 0x18f   : > { %v952_v36 = vadd.f32 %v951_v56, %v918_v24  ;;  %v885_v37 = vadd.f32 %v884_v28, %v639_v26  ;;  %825 = vst [vmem:[%s1444_s11 + $0x28] sm:$0xff] %v710_v35  ;;  %v897_v39 = vmul.f32 %v710_v35, %v710_v35  ;;  %v797_v63 = vpop.f32.mrb[8].mxu1 }
 0x190   : > { %v927_v20 = vadd.f32 %v926_v1, %v896_v32  ;;  %v860_v25 = vadd.f32 %v859_v31, %v710_v35  ;;  %826 = vst [vmem:[%s1444_s11 + $0x30] sm:$0xff] %v797_v63  ;;  %v799_v40 = vpop.f32.mrb[9].mxu1  ;;  %v898_v38 = vmul.f32 %v797_v63, %v797_v63 }
 0x191   : > { %v953_v41 = vadd.f32 %v952_v36, %v919_v30  ;;  %v714_v42 = vpop.f32.mrb[10].mxu0  ;;  %827 = vst [vmem:[%s1444_s11 + $0x38] sm:$0xff] %v799_v40  ;;  %v899_v58 = vmul.f32 %v799_v40, %v799_v40 }
 0x192   : > { %832 = vst [vmem:[%s1444_s11 + $0x60] sm:$0xff] %v714_v42  ;;  %v868_v44 = vadd.f32 %v867_v9, %v714_v42  ;;  %v904_v45 = vmul.f32 %v714_v42, %v714_v42  ;;  %v716_v46 = vpop.f32.mrb[11].mxu0  ;;  %v861_v47 = vadd.f32 %v860_v25, %v797_v63  ;;  %v928_v48 = vadd.f32 %v927_v20, %v897_v39 }
 0x193   : > { %833 = vst [vmem:[%s1444_s11 + $0x68] sm:$0xff] %v716_v46  ;;  %v905_v49 = vmul.f32 %v716_v46, %v716_v46  ;;  %v803_v50 = vpop.f32.mrb[10].mxu1 }
 0x194   : > { %v936_v51 = vadd.f32 %v935_v13, %v904_v45  ;;  %v869_v52 = vadd.f32 %v868_v44, %v716_v46  ;;  %834 = vst [vmem:[%s1444_s11 + $0x70] sm:$0xff] %v803_v50  ;;  %v906_v53 = vmul.f32 %v803_v50, %v803_v50  ;;  %v805_v54 = vpop.f32.mrb[11].mxu1  ;;  %v862_v55 = vadd.f32 %v861_v47, %v799_v40  ;;  %v853_v40 = vld [vmem:[%s1483_s14 + $0x8] sm:$0xff]  ;;  %v854_v45 = vld [vmem:[%s1483_s14 + $0x10] sm:$0xff]  ;;  %v855_v47 = vld [vmem:[%s1483_s14 + $0x18] sm:$0xff] }
 0x195   : > { %v720_v57 = vpop.f32.mrb[12].mxu0  ;;  %835 = vst [vmem:[%s1444_s11 + $0x78] sm:$0xff] %v805_v54  ;;  %v929_v59 = vadd.f32 %v928_v48, %v898_v38  ;;  %v907_v8 = vmul.f32 %v805_v54, %v805_v54 }
 0x196   : > { %840 = vst [vmem:[%s1444_s11 + $0xa0] sm:$0xff] %v720_v57  ;;  %v877_v60 = vadd.f32 %v876_v22, %v720_v57  ;;  %v912_v62 = vmul.f32 %v720_v57, %v720_v57  ;;  %863 = vadd.xlane.f32.xlu1 %v862_v55  ;;  %v722_v0 = vpop.f32.mrb[13].mxu0  ;;  %v937_v1 = vadd.f32 %v936_v51, %v905_v49 }
 0x197   : > { %v870_v2 = vadd.f32 %v869_v52, %v803_v50  ;;  %841 = vst [vmem:[%s1444_s11 + $0xa8] sm:$0xff] %v722_v0  ;;  %v913_v3 = vmul.f32 %v722_v0, %v722_v0  ;;  %v930_v4 = vadd.f32 %v929_v59, %v899_v58  ;;  %v809_v5 = vpop.f32.mrb[12].mxu1 }
 0x198   : > { %v945_v7 = vadd.f32 %v944_v27, %v912_v62  ;;  %v878_v34 = vadd.f32 %v877_v60, %v722_v0  ;;  %842 = vst [vmem:[%s1444_s11 + $0xb0] sm:$0xff] %v809_v5  ;;  %v811_v61 = vpop.f32.mrb[13].mxu1  ;;  %v938_v9 = vadd.f32 %v937_v1, %v906_v53  ;;  %v914_v10 = vmul.f32 %v809_v5, %v809_v5 }
 0x199   : > { %931 = vadd.xlane.f32.xlu0 %v930_v4  ;;  %v726_v33 = vpop.f32.mrb[14].mxu0  ;;  %843 = vst [vmem:[%s1444_s11 + $0xb8] sm:$0xff] %v811_v61  ;;  %v871_v11 = vadd.f32 %v870_v2, %v805_v54  ;;  %v915_v26 = vmul.f32 %v811_v61, %v811_v61 }
 0x19a   : > { %848 = vst [vmem:[%s1444_s11 + $0xe0] sm:$0xff] %v726_v33  ;;  %v886_v12 = vadd.f32 %v885_v37, %v726_v33  ;;  %v920_v13 = vmul.f32 %v726_v33, %v726_v33  ;;  %v728_v14 = vpop.f32.mrb[15].mxu0  ;;  %v939_v15 = vadd.f32 %v938_v9, %v907_v8  ;;  %v879_v16 = vadd.f32 %v878_v34, %v809_v5  ;;  %v852_v37 = vld [vmem:[%s1483_s14] sm:$0xff] }
 0x19b   : > { %849 = vst [vmem:[%s1444_s11 + $0xe8] sm:$0xff] %v728_v14  ;;  %v921_v43 = vmul.f32 %v728_v14, %v728_v14  ;;  %v815_v17 = vpop.f32.mrb[14].mxu1  ;;  %v946_v18 = vadd.f32 %v945_v7, %v913_v3 }
 0x19c   : > { %v954_v19 = vadd.f32 %v953_v41, %v920_v13  ;;  %v887_v21 = vadd.f32 %v886_v12, %v728_v14  ;;  %940 = vadd.xlane.f32.xlu1 %v939_v15  ;;  %850 = vst [vmem:[%s1444_s11 + $0xf0] sm:$0xff] %v815_v17  ;;  %v922_v22 = vmul.f32 %v815_v17, %v815_v17  ;;  %v817_v23 = vpop.f32.mrb[15].mxu1 }
 0x19d   : > { %v880_v24 = vadd.f32 %v879_v16, %v811_v61  ;;  %872 = vadd.xlane.f32.xlu0 %v871_v11  ;;  %851 = vst [vmem:[%s1444_s11 + $0xf8] sm:$0xff] %v817_v23  ;;  %v947_v56 = vadd.f32 %v946_v18, %v914_v10  ;;  %v923_v30 = vmul.f32 %v817_v23, %v817_v23 }
 0x19e   : > { %v955_v27 = vadd.f32 %v954_v19, %v921_v43  ;;  %v888_v28 = vadd.f32 %v887_v21, %v815_v17 }
 0x19f   : > { %v948_v29 = vadd.f32 %v947_v56, %v915_v26 }
 0x1a0   : > { %v889_v31 = vadd.f32 %v888_v28, %v817_v23  ;;  %v956_v32 = vadd.f32 %v955_v27, %v922_v22 }
 0x1a1   : > { %881 = vadd.xlane.f32.xlu0 %v880_v24 }
 0x1a2   : > { %890 = vadd.xlane.f32.xlu1 %v889_v31  ;;  %v957_v35 = vadd.f32 %v956_v32, %v923_v30 }
 0x1a5   : > { %949 = vadd.xlane.f32.xlu0 %v948_v29 }
 0x1a6   : > { %958 = vadd.xlane.f32.xlu1 %v957_v35 }
 0x223   : > { %v864_v36 = vpop.xlane.xlu1 %863 }
 0x226   : > { %v932_v39 = vpop.xlane.xlu0 %931 }
 0x227   : > { %v961_v63 = vsel %vm960_vm2, %v864_v36, %v932_v39 }
 0x228   : > { %v965_v20 = vadd.f32 %v961_v63, %v852_v37 }
 0x229   : > { %v941_v25 = vpop.xlane.xlu1 %940 }
 0x22a   : > { %970 = vst.msk [vmem:[%s1483_s14] sm:$0xff] %vm274_vm1, %v965_v20  ;;  %v873_v41 = vpop.xlane.xlu0 %872 }
 0x22b   : > { %v962_v6 = vsel %vm960_vm2, %v873_v41, %v941_v25 }
 0x22c   : > { %v966_v42 = vadd.f32 %v962_v6, %v853_v40 }
 0x22e   : > { %971 = vst.msk [vmem:[%s1483_s14 + $0x8] sm:$0xff] %vm274_vm1, %v966_v42  ;;  %v882_v38 = vpop.xlane.xlu0 %881 }
 0x22f   : > { %v891_v44 = vpop.xlane.xlu1 %890 }
 0x232   : > { %v950_v46 = vpop.xlane.xlu0 %949 }
 0x233   : > { %v963_v48 = vsel %vm960_vm2, %v882_v38, %v950_v46  ;;  %v959_v49 = vpop.xlane.xlu1 %958 }
 0x234   : > { %v967_v50 = vadd.f32 %v963_v48, %v854_v45  ;;  %v964_v51 = vsel %vm960_vm2, %v891_v44, %v959_v49 }
 0x235   : > { %v968_v52 = vadd.f32 %v964_v51, %v855_v47 }
 0x236   : > { %972 = vst.msk [vmem:[%s1483_s14 + $0x10] sm:$0xff] %vm274_vm1, %v967_v50 }
 0x237   : > { %973 = vst.msk [vmem:[%s1483_s14 + $0x18] sm:$0xff] %vm274_vm1, %v968_v52 }
 0x238 PF: > { %s15_s17 = sadd.s32 1, %s1227_s17   ;;  %s1527_s15 = smov %s1223_s16 }
 0x239   : > { %p12_p5 = scmp.ge.s32.totalorder %s15_s17, 4   ;;  %s1528_s16 = smov %s1530_s18 }
 0x23b   :  { %14 = sbr.rel (!%p12_p5) target bundleno = 2 (0x2), region = 81 }

// kernel: pointcn_stack_forward.7
= control target key start
LH: loop header
LB: loop body
LE: loop exit
PB: predicated region body
PF: predicated region fallthrough
CT: control target
= control target key end

     0   :  { %s1468_s21 = smov 0   ;;  %s1470_s22 = smov 0   ;;  %s1871_s0 = inlined_call_operand.vmem [shape: f32[2,32,1024], index: 0, kind: input, shape index: {}]   ;;  %s1872_s1 = inlined_call_operand.vmem [shape: f32[2,32,1024], index: 1, kind: input, shape index: {}]   ;;  %s1873_s2 = inlined_call_operand.vmem [shape: f32[2,32,2], index: 2, kind: input, shape index: {}]   ;;  %s1874_s3 = inlined_call_operand.vmem [shape: f32[32,32], index: 3, kind: input, shape index: {}]   ;;  %s1875_s4 = inlined_call_operand.vmem [shape: f32[32,1], index: 4, kind: input, shape index: {}]   ;;  %s1876_s5 = inlined_call_operand.vmem [shape: f32[2,32,1024], index: 5, kind: output, shape index: {0}]   ;;  %s1877_s6 = inlined_call_operand.vmem [shape: f32[2,32,2], index: 6, kind: output, shape index: {1}]  }
   0x1   :  { %s1472_s23 = smov 0  }
   0x2 LB: > { %s29_s24 = sadd.s32 1, %s1424_s22  ;;  %p1306_p0 = scmp.ge.s32.totalorder %s1428_s23, 1  ;;  %s1428_s23 = sphi %s1472_s23, %s17_s23   ;;  %s1424_s22 = sphi %s1470_s22, %s1879_s22   ;;  %s1420_s21 = sphi %s1468_s21, %s1878_s21  }
   0x3   : > { %p31_p1 = scmp.ge.s32.totalorder %s29_s24, 2  ;;  %p263_p2 = scmp.lt.s32.totalorder %s1428_s23, 3 }
   0x5   : > { %s1881_s24 = smov (%p31_p1, %s29_s24), 0  ;;  %p264_p3 = pnand %p1306_p0, %p263_p2 }
   0x6   : > { %p321_p4 = scmp.lt.s32.totalorder (!%p264_p3), %s1420_s21, 1  ;;  %v1430_v0 = vmov (!%p264_p3), 1   ;;  %v1431_v1 = vmov (!%p264_p3), 0   ;;  %v1432_v6 = vmov (!%p264_p3), 0.0   ;;  %v541_v7 = vld [vmem:[%s1875_s4] sm:$0xff] (!%p264_p3)  ;;  %v542_v8 = vld [vmem:[%s1875_s4 + $0x8] sm:$0xff] (!%p264_p3) }
   0x7   : > { %267 = sbr.rel (%p264_p3) target bundleno = 583 (0x247), region = 40  ;;  %1400 = vset.pattern.permute.xlu1 (!%p264_p3), %v1430_v0  ;;  %1399 = vset.pattern.permute.xlu0 (!%p264_p3), %v1431_v1  ;;  %v543_v9 = vld [vmem:[%s1875_s4 + $0x10] sm:$0xff] (!%p264_p3)  ;;  %v544_v10 = vld [vmem:[%s1875_s4 + $0x18] sm:$0xff] (!%p264_p3)  ;;  %vm565_vm0 = vcmask (!%p264_p3), 261120   ;;  %vm364_vm1 = vcmask (!%p264_p3), 15360   ;;  %vm1138_vm2 = vcmask (!%p264_p3), 7168  }
   0x8   : > { %642 = vmatprep.mubr.f32.mxu0 (!%p264_p3), %v1432_v6  ;;  %731 = vmatprep.mubr.f32.mxu1 (!%p264_p3), %v1432_v6 }
   0xe   : > { %s1883_s21 = smov (!%p321_p4, %s1420_s21), 1 }
   0xf   : > { %s1337_s25 = sshll.u32 %s1883_s21, 5  ;;  %s1509_s13 = sshll.u32 %s1883_s21, 8 }
  0x10   : > { %s344_s28 = scalar_lea.vmem %s1873_s2, %s1337_s25  ;;  %s1515_s16 = scalar_lea.vmem %s1871_s0, %s1509_s13 }
  0x11   : > { %v401_v2 = vld [vmem:[%s344_s28] sm:$0xff]  ;;  %v402_v3 = vld [vmem:[%s344_s28 + $0x8] sm:$0xff]  ;;  %v403_v4 = vld [vmem:[%s344_s28 + $0x10] sm:$0xff]  ;;  %s1667_s8 = scalar_lea.vmem %s1872_s1, %s1509_s13  ;;  %s1681_s11 = scalar_lea.vmem %s1876_s5, %s1509_s13 }
  0x12   : > { %458 = vperm.xlu1 %1400, %v401_v2   ;;  %407 = vperm.xlu0 %1399, %v401_v2   ;;  %v404_v5 = vld [vmem:[%s344_s28 + $0x18] sm:$0xff]  ;;  %v370_v11 = vld [vmem:[%s1515_s16 + $0x8] sm:$0xff]  ;;  %v369_v13 = vld [vmem:[%s1515_s16] sm:$0xff]  ;;  %s1832_s14 = scalar_lea.vmem %s1877_s6, %s1337_s25 }
  0x13   : > { %v372_v12 = vld [vmem:[%s1515_s16 + $0x18] sm:$0xff]  ;;  %v371_v14 = vld [vmem:[%s1515_s16 + $0x10] sm:$0xff]  ;;  %v374_v15 = vld [vmem:[%s1515_s16 + $0x28] sm:$0xff]  ;;  %365 = vst.msk [vmem:[%s1832_s14] sm:$0xff] %vm364_vm1, %v1432_v6 }
  0x14   : > { %v376_v16 = vld [vmem:[%s1515_s16 + $0x38] sm:$0xff]  ;;  %v373_v17 = vld [vmem:[%s1515_s16 + $0x20] sm:$0xff]  ;;  %v375_v18 = vld [vmem:[%s1515_s16 + $0x30] sm:$0xff]  ;;  %366 = vst.msk [vmem:[%s1832_s14 + $0x8] sm:$0xff] %vm364_vm1, %v1432_v6 }
  0x15   : > { %v378_v25 = vld [vmem:[%s1515_s16 + $0x48] sm:$0xff]  ;;  %v380_v26 = vld [vmem:[%s1515_s16 + $0x58] sm:$0xff]  ;;  %v377_v33 = vld [vmem:[%s1515_s16 + $0x40] sm:$0xff]  ;;  %367 = vst.msk [vmem:[%s1832_s14 + $0x10] sm:$0xff] %vm364_vm1, %v1432_v6 }
  0x16   : > { %462 = vperm.xlu1 %1400, %v402_v3   ;;  %412 = vperm.xlu0 %1399, %v402_v3   ;;  %v379_v35 = vld [vmem:[%s1515_s16 + $0x50] sm:$0xff]  ;;  %v382_v39 = vld [vmem:[%s1515_s16 + $0x68] sm:$0xff]  ;;  %v384_v46 = vld [vmem:[%s1515_s16 + $0x78] sm:$0xff]  ;;  %368 = vst.msk [vmem:[%s1832_s14 + $0x18] sm:$0xff] %vm364_vm1, %v1432_v6 }
  0x17   : > { %v386_v52 = vld [vmem:[%s1515_s16 + $0x88] sm:$0xff]  ;;  %v388_v53 = vld [vmem:[%s1515_s16 + $0x98] sm:$0xff]  ;;  %v385_v63 = vld [vmem:[%s1515_s16 + $0x80] sm:$0xff] }
  0x18   : > { %v394_v57 = vld [vmem:[%s1515_s16 + $0xc8] sm:$0xff]  ;;  %v396_v58 = vld [vmem:[%s1515_s16 + $0xd8] sm:$0xff] }
  0x1a   : > { %1401 = vset.pattern.permute.xlu1 %v1431_v1  ;;  %417 = vperm.xlu0 %1399, %v403_v4  }
  0x1b   : > { %422 = vperm.xlu1 %1401, %v404_v5  }
  0x1e   : > { %1402 = vset.pattern.permute.xlu0 %v1430_v0 }
  0x1f   : > { %1403 = vset.pattern.permute.xlu1 %v1430_v0  ;;  %466 = vperm.xlu0 %1402, %v403_v4   ;;  %v393_v0 = vld [vmem:[%s1515_s16 + $0xc0] sm:$0xff] }
  0x20   : > { %470 = vperm.xlu1 %1403, %v404_v5  }
  0x23   : > { %1405 = vset.pattern.permute.xlu0 %v1431_v1 }
  0x24   : > { %1404 = vset.pattern.permute.xlu1 %v1431_v1  ;;  %552 = vperm.xlu0 %1405, %v542_v8  }
  0x25   : > { %547 = vperm.xlu1 %1404, %v541_v7  }
  0x29   : > { %557 = vperm.xlu1 %1404, %v543_v9   ;;  %v387_v9 = vld [vmem:[%s1515_s16 + $0x90] sm:$0xff] }
  0x2d   : > { %562 = vperm.xlu1 %1404, %v544_v10   ;;  %v395_v10 = vld [vmem:[%s1515_s16 + $0xd0] sm:$0xff] }
  0x91   : > { %v459_v19 = vpop.permute.xlu1 %458  ;;  %v408_v20 = vpop.permute.xlu0 %407 }
  0x92   : > { %v426_v21 = vmul.f32 %v408_v20, %v370_v11  ;;  %v428_v22 = vmul.f32 %v408_v20, %v372_v12  ;;  %v425_v23 = vmul.f32 %v408_v20, %v369_v13  ;;  %v427_v24 = vmul.f32 %v408_v20, %v371_v14 }
  0x93   : > { %v430_v27 = vmul.f32 %v408_v20, %v374_v15  ;;  %v432_v28 = vmul.f32 %v408_v20, %v376_v16  ;;  %v429_v29 = vmul.f32 %v408_v20, %v373_v17  ;;  %v431_v30 = vmul.f32 %v408_v20, %v375_v18  ;;  %v381_v15 = vld [vmem:[%s1515_s16 + $0x60] sm:$0xff] }
  0x94   : > { %v474_v31 = vadd.f32 %v459_v19, %v426_v21  ;;  %v476_v32 = vadd.f32 %v459_v19, %v428_v22  ;;  %v473_v34 = vadd.f32 %v459_v19, %v425_v23  ;;  %v475_v36 = vadd.f32 %v459_v19, %v427_v24 }
  0x95   : > { %v1529_v37 = vpop.permute.xlu1 %462  ;;  %v1531_v38 = vpop.permute.xlu0 %412  ;;  %v1534_v40 = vadd.f32 %v459_v19, %v430_v27  ;;  %v1536_v41 = vadd.f32 %v459_v19, %v432_v28  ;;  %v1538_v42 = vadd.f32 %v459_v19, %v429_v29  ;;  %v1543_v47 = vadd.f32 %v459_v19, %v431_v30 }
  0x96   : > { %v434_v43 = vmul.f32 %v1531_v38, %v378_v25  ;;  %v506_v44 = vmax.f32 %v474_v31, 0.0  ;;  %v436_v45 = vmul.f32 %v1531_v38, %v380_v26  ;;  %v508_v48 = vmax.f32 %v476_v32, 0.0 }
  0x97   : > { %v433_v49 = vmul.f32 %v1531_v38, %v377_v33  ;;  %v505_v50 = vmax.f32 %v473_v34, 0.0  ;;  %v435_v51 = vmul.f32 %v1531_v38, %v379_v35  ;;  %v507_v56 = vmax.f32 %v475_v36, 0.0 }
  0x98   : > { %v482_v54 = vadd.f32 %v1529_v37, %v434_v43  ;;  %v484_v55 = vadd.f32 %v1529_v37, %v436_v45  ;;  %v438_v59 = vmul.f32 %v1531_v38, %v382_v39  ;;  %v510_v1 = vmax.f32 %v1534_v40, 0.0  ;;  %v383_v45 = vld [vmem:[%s1515_s16 + $0x70] sm:$0xff] }
  0x99   : > { %v1554_v60 = vpop.permute.xlu0 %417  ;;  %v481_v61 = vadd.f32 %v1529_v37, %v433_v49  ;;  %v483_v62 = vadd.f32 %v1529_v37, %v435_v51  ;;  %v440_v2 = vmul.f32 %v1531_v38, %v384_v46  ;;  %v512_v27 = vmax.f32 %v1536_v41, 0.0 }
  0x9a   : > { %v1562_v3 = vpop.permute.xlu1 %422  ;;  %v514_v4 = vmax.f32 %v482_v54, 0.0  ;;  %v516_v5 = vmax.f32 %v484_v55, 0.0  ;;  %v442_v7 = vmul.f32 %v1554_v60, %v386_v52  ;;  %v444_v8 = vmul.f32 %v1554_v60, %v388_v53  ;;  %v390_v54 = vld [vmem:[%s1515_s16 + $0xa8] sm:$0xff] }
  0x9b   : > { %v513_v11 = vmax.f32 %v481_v61, 0.0  ;;  %v515_v12 = vmax.f32 %v483_v62, 0.0  ;;  %v450_v13 = vmul.f32 %v1562_v3, %v394_v57  ;;  %v452_v14 = vmul.f32 %v1562_v3, %v396_v58  ;;  %v398_v55 = vld [vmem:[%s1515_s16 + $0xe8] sm:$0xff]  ;;  %v392_v61 = vld [vmem:[%s1515_s16 + $0xb8] sm:$0xff] }
  0x9c   : > { %v1340_v16 = vpack.c.bf16 %v514_v4, %v506_v44  ;;  %v1348_v17 = vpack.c.bf16 %v516_v5, %v508_v48  ;;  %v441_v18 = vmul.f32 %v1554_v60, %v385_v63  ;;  %v449_v19 = vmul.f32 %v1562_v3, %v393_v0  ;;  %v400_v62 = vld [vmem:[%s1515_s16 + $0xf8] sm:$0xff]  ;;  %v389_v5 = vld [vmem:[%s1515_s16 + $0xa0] sm:$0xff] }
  0x9d   : > { %v1342_v20 = vpack.c.bf16 %v513_v11, %v505_v50  ;;  %v1350_v21 = vpack.c.bf16 %v515_v12, %v507_v56  ;;  %v443_v22 = vmul.f32 %v1554_v60, %v387_v9  ;;  %v451_v23 = vmul.f32 %v1562_v3, %v395_v10  ;;  %v397_v10 = vld [vmem:[%s1515_s16 + $0xe0] sm:$0xff]  ;;  %v391_v11 = vld [vmem:[%s1515_s16 + $0xb0] sm:$0xff] }
  0x9e   : > { %v1575_v24 = vpop.permute.xlu0 %466  ;;  %1341 = vmatprep.subr.bf16.mxu0 %v1340_v16  ;;  %1349 = vmatprep.subr.bf16.mxu1 %v1348_v17  ;;  %v486_v25 = vadd.f32 %v1529_v37, %v438_v59  ;;  %v488_v26 = vadd.f32 %v1529_v37, %v440_v2  ;;  %v437_v28 = vmul.f32 %v1531_v38, %v381_v15  ;;  %v509_v33 = vmax.f32 %v1538_v42, 0.0 }
  0x9f   : > { %v1581_v29 = vpop.permute.xlu1 %470  ;;  %1343 = vmatpush1.bf16.msra.mxu0 %v1342_v20  ;;  %1351 = vmatpush1.bf16.msra.mxu1 %v1350_v21  ;;  %v490_v30 = vadd.f32 %v1575_v24, %v442_v7  ;;  %v492_v31 = vadd.f32 %v1575_v24, %v444_v8  ;;  %v489_v32 = vadd.f32 %v1575_v24, %v441_v18  ;;  %v511_v12 = vmax.f32 %v1543_v47, 0.0  ;;  %v399_v18 = vld [vmem:[%s1515_s16 + $0xf0] sm:$0xff] }
  0xa0   : > { %v498_v34 = vadd.f32 %v1581_v29, %v450_v13  ;;  %v500_v35 = vadd.f32 %v1581_v29, %v452_v14  ;;  %v497_v36 = vadd.f32 %v1581_v29, %v449_v19  ;;  %v491_v39 = vadd.f32 %v1575_v24, %v443_v22 }
  0xa1   : > { %v522_v40 = vmax.f32 %v490_v30, 0.0  ;;  %v524_v41 = vmax.f32 %v492_v31, 0.0  ;;  %v521_v43 = vmax.f32 %v489_v32, 0.0  ;;  %v499_v44 = vadd.f32 %v1581_v29, %v451_v23  ;;  %v538_v30 = vld [vmem:[%s1874_s3 + $0x8] sm:$0xff] }
  0xa2   : > { %v530_v46 = vmax.f32 %v498_v34, 0.0  ;;  %v532_v42 = vmax.f32 %v500_v35, 0.0  ;;  %v529_v48 = vmax.f32 %v497_v36, 0.0  ;;  %v523_v49 = vmax.f32 %v491_v39, 0.0 }
  0xa3   : > { %v531_v50 = vmax.f32 %v499_v44, 0.0  ;;  %v518_v51 = vmax.f32 %v486_v25, 0.0  ;;  %v520_v52 = vmax.f32 %v488_v26, 0.0  ;;  %v485_v53 = vadd.f32 %v1529_v37, %v437_v28 }
  0xa4   : > { %v1344_v56 = vpack.c.bf16 %v530_v46, %v522_v40  ;;  %v1352_v57 = vpack.c.bf16 %v532_v42, %v524_v41  ;;  %v1346_v58 = vpack.c.bf16 %v529_v48, %v521_v43  ;;  %v439_v59 = vmul.f32 %v1531_v38, %v383_v45  ;;  %v537_v38 = vld [vmem:[%s1874_s3] sm:$0xff]  ;;  %v539_v43 = vld [vmem:[%s1874_s3 + $0x10] sm:$0xff]  ;;  %v1669_v44 = vpop.permute.xlu1 %547 }
  0xa5   : > { %v1354_v63 = vpack.c.bf16 %v531_v50, %v523_v49  ;;  %v1356_v0 = vpack.c.bf16 %v518_v51, %v510_v1  ;;  %v1364_v2 = vpack.c.bf16 %v520_v52, %v512_v27  ;;  %v517_v4 = vmax.f32 %v485_v53, 0.0  ;;  %v934_v46 = vld [vmem:[%s1667_s8] sm:$0xff]  ;;  %v936_v48 = vld [vmem:[%s1667_s8 + $0x10] sm:$0xff]  ;;  %v935_v51 = vld [vmem:[%s1667_s8 + $0x8] sm:$0xff] }
  0xa6   : > { %1345 = vmatprep.subr.bf16.mxu0 %v1344_v56  ;;  %1353 = vmatprep.subr.bf16.mxu1 %v1352_v57  ;;  %v487_v7 = vadd.f32 %v1529_v37, %v439_v59  ;;  %v446_v8 = vmul.f32 %v1554_v60, %v390_v54  ;;  %v454_v9 = vmul.f32 %v1562_v3, %v398_v55  ;;  %v937_v54 = vld [vmem:[%s1667_s8 + $0x18] sm:$0xff]  ;;  %v1684_v56 = vpop.permute.xlu0 %552 }
  0xa7   : > { %1347 = vmatpush1.bf16.msra.mxu0 %v1346_v58  ;;  %1355 = vmatpush1.bf16.msra.mxu1 %v1354_v63  ;;  %v1358_v1 = vpack.c.bf16 %v517_v4, %v509_v33  ;;  %v448_v13 = vmul.f32 %v1554_v60, %v392_v61  ;;  %v456_v37 = vmul.f32 %v1562_v3, %v400_v62  ;;  %v942_v63 = vld [vmem:[%s1667_s8 + $0x40] sm:$0xff] }
  0xa8   : > { %1357 = vmatprep.subr.bf16.mxu0 %v1356_v0  ;;  %1365 = vmatprep.subr.bf16.mxu1 %v1364_v2  ;;  %v519_v14 = vmax.f32 %v487_v7, 0.0  ;;  %v494_v15 = vadd.f32 %v1575_v24, %v446_v8  ;;  %v502_v16 = vadd.f32 %v1581_v29, %v454_v9  ;;  %v445_v17 = vmul.f32 %v1554_v60, %v389_v5  ;;  %v1688_v2 = vpop.permute.xlu1 %557  ;;  %v943_v8 = vld [vmem:[%s1667_s8 + $0x48] sm:$0xff] }
  0xa9   : > { %v496_v19 = vadd.f32 %v1575_v24, %v448_v13  ;;  %v504_v20 = vadd.f32 %v1581_v29, %v456_v37  ;;  %v453_v47 = vmul.f32 %v1562_v3, %v397_v10  ;;  %v447_v21 = vmul.f32 %v1554_v60, %v391_v11  ;;  %v945_v37 = vld [vmem:[%s1667_s8 + $0x58] sm:$0xff] }
  0xaa   : > { %1317 = vmatmul.mubr.msk.f32.vlgmr.msra.gmra.mrb[0].mxu0 %vm565_vm0, %v537_v38  ;;  %1321 = vmatmul.mubr.msk.f32.vlgmr.msra.gmra.mrb[0].mxu1 %vm565_vm0, %v537_v38  ;;  %v1366_v22 = vpack.c.bf16 %v519_v14, %v511_v12  ;;  %v526_v23 = vmax.f32 %v494_v15, 0.0  ;;  %v534_v25 = vmax.f32 %v502_v16, 0.0  ;;  %v493_v26 = vadd.f32 %v1575_v24, %v445_v17  ;;  %v944_v12 = vld [vmem:[%s1667_s8 + $0x50] sm:$0xff] }
  0xab   : > { %1359 = vmatpush1.bf16.msra.mxu0 %v1358_v1  ;;  %v528_v27 = vmax.f32 %v496_v19, 0.0  ;;  %v536_v28 = vmax.f32 %v504_v20, 0.0  ;;  %648 = vmatprep.mubr.f32.mxu0 %v1432_v6  ;;  %v501_v60 = vadd.f32 %v1581_v29, %v453_v47  ;;  %v455_v31 = vmul.f32 %v1562_v3, %v399_v18 }
  0xac   : > { %1367 = vmatpush1.bf16.msra.mxu1 %v1366_v22  ;;  %v1360_v32 = vpack.c.bf16 %v534_v25, %v526_v23  ;;  %737 = vmatprep.mubr.f32.mxu1 %v1432_v6  ;;  %v525_v33 = vmax.f32 %v493_v26, 0.0  ;;  %v495_v34 = vadd.f32 %v1575_v24, %v447_v21  ;;  %v950_v21 = vld [vmem:[%s1667_s8 + $0x80] sm:$0xff] }
  0xad   : > { %v1368_v35 = vpack.c.bf16 %v536_v28, %v528_v27  ;;  %v533_v36 = vmax.f32 %v501_v60, 0.0  ;;  %v503_v39 = vadd.f32 %v1581_v29, %v455_v31  ;;  %v540_v29 = vld [vmem:[%s1874_s3 + $0x18] sm:$0xff] }
  0xae   : > { %1361 = vmatprep.subr.bf16.mxu0 %v1360_v32  ;;  %1318 = vmatmul.mubr.msk.f32.gmra.mrb[2].mxu0 %vm565_vm0, %v538_v30  ;;  %v527_v40 = vmax.f32 %v495_v34, 0.0  ;;  %v951_v32 = vld [vmem:[%s1667_s8 + $0x88] sm:$0xff]  ;;  %v1708_v34 = vpop.permute.xlu1 %562 }
  0xaf   : > { %1369 = vmatprep.subr.bf16.mxu1 %v1368_v35  ;;  %1322 = vmatmul.mubr.msk.f32.gmra.mrb[2].mxu1 %vm565_vm0, %v538_v30  ;;  %v1362_v41 = vpack.c.bf16 %v533_v36, %v525_v33  ;;  %v535_v3 = vmax.f32 %v503_v39, 0.0 }
  0xb0   : > { %654 = vmatprep.mubr.f32.mxu0 %v1432_v6  ;;  %743 = vmatprep.mubr.f32.mxu1 %v1432_v6 }
  0xb1   : > { %1363 = vmatpush1.bf16.msra.mxu0 %v1362_v41  ;;  %v1370_v24 = vpack.c.bf16 %v535_v3, %v527_v40  ;;  %v952_v41 = vld [vmem:[%s1667_s8 + $0x90] sm:$0xff] }
  0xb2   : > { %1319 = vmatmul.mubr.msk.f32.gmra.mrb[4].mxu0 %vm565_vm0, %v539_v43 }
  0xb3   : > { %1371 = vmatpush1.bf16.msra.mxu1 %v1370_v24  ;;  %660 = vmatprep.mubr.f32.mxu0 %v1432_v6 }
  0xb4   : > { %1323 = vmatmul.mubr.msk.f32.gmra.mrb[4].mxu1 %vm565_vm0, %v539_v43 }
  0xb5   : > { %749 = vmatprep.mubr.f32.mxu1 %v1432_v6 }
  0xb6   : > { %1320 = vmatmul.mubr.msk.f32.gmra.mrb[6].mxu0 %vm565_vm0, %v540_v29 }
  0xb7   : > { %820 = vmatprep.mubr.f32.mxu0 %v1432_v6 }
  0xb8   : > { %1324 = vmatmul.mubr.msk.f32.gmra.mrb[6].mxu1 %vm565_vm0, %v540_v29 }
  0xb9   : > { %909 = vmatprep.mubr.f32.mxu1 %v1432_v6 }
  0xba   : > { %1325 = vmatmul.mubr.msk.f32.vlgmr.msra.gmra.mrb[8].mxu0 %vm565_vm0, %v537_v38 }
  0xbb   : > { %826 = vmatprep.mubr.f32.mxu0 %v1432_v6 }
  0xbc   : > { %1329 = vmatmul.mubr.msk.f32.vlgmr.msra.gmra.mrb[8].mxu1 %vm565_vm0, %v537_v38 }
  0xbd   : > { %915 = vmatprep.mubr.f32.mxu1 %v1432_v6 }
  0xbe   : > { %1326 = vmatmul.mubr.msk.f32.gmra.mrb[10].mxu0 %vm565_vm0, %v538_v30 }
  0xbf   : > { %832 = vmatprep.mubr.f32.mxu0 %v1432_v6 }
  0xc0   : > { %1330 = vmatmul.mubr.msk.f32.gmra.mrb[10].mxu1 %vm565_vm0, %v538_v30 }
  0xc1   : > { %921 = vmatprep.mubr.f32.mxu1 %v1432_v6 }
  0xc2   : > { %1327 = vmatmul.mubr.msk.f32.gmra.mrb[12].mxu0 %vm565_vm0, %v539_v43 }
  0xc3   : > { %838 = vmatprep.mubr.f32.mxu0 %v1432_v6 }
  0xc4   : > { %1331 = vmatmul.mubr.msk.f32.gmra.mrb[12].mxu1 %vm565_vm0, %v539_v43 }
  0xc5   : > { %927 = vmatprep.mubr.f32.mxu1 %v1432_v6 }
  0xc6   : > { %1328 = vmatmul.mubr.msk.f32.gmra.mrb[14].mxu0 %vm565_vm0, %v540_v29 }
  0xc8   : > { %1332 = vmatmul.mubr.msk.f32.gmra.mrb[14].mxu1 %vm565_vm0, %v540_v29 }
 0x17d   : > { %v644_v45 = vpop.f32.mrb[0].mxu0  ;;  %v733_v42 = vpop.f32.mrb[0].mxu1 }
 0x17e   : > { %v645_v49 = vadd.f32 %v644_v45, %v1669_v44  ;;  %v646_v50 = vpop.f32.mrb[1].mxu0  ;;  %v734_v52 = vadd.f32 %v733_v42, %v1669_v44  ;;  %v735_v53 = vpop.f32.mrb[1].mxu1 }
 0x17f   : > { %v647_v55 = vadd.f32 %v646_v50, %v1669_v44  ;;  %v736_v57 = vadd.f32 %v735_v53, %v1669_v44 }
 0x180   : > { %v966_v58 = vadd.f32 %v934_v46, %v645_v49  ;;  %v968_v59 = vadd.f32 %v936_v48, %v734_v52  ;;  %v953_v46 = vld [vmem:[%s1667_s8 + $0x98] sm:$0xff]  ;;  %v958_v48 = vld [vmem:[%s1667_s8 + $0xc0] sm:$0xff] }
 0x181   : > { %v967_v61 = vadd.f32 %v935_v51, %v647_v55  ;;  %v650_v62 = vpop.f32.mrb[2].mxu0  ;;  %v969_v0 = vadd.f32 %v937_v54, %v736_v57  ;;  %v959_v54 = vld [vmem:[%s1667_s8 + $0xc8] sm:$0xff] }
 0x182   : > { %998 = vst [vmem:[%s1681_s11] sm:$0xff] %v966_v58  ;;  %v1070_v4 = vmul.f32 %v966_v58, %v966_v58  ;;  %1000 = vst [vmem:[%s1681_s11 + $0x10] sm:$0xff] %v968_v59  ;;  %v651_v5 = vadd.f32 %v650_v62, %v1684_v56  ;;  %v652_v7 = vpop.f32.mrb[3].mxu0  ;;  %v739_v9 = vpop.f32.mrb[2].mxu1  ;;  %v1072_v38 = vmul.f32 %v968_v59, %v968_v59 }
 0x183   : > { %999 = vst [vmem:[%s1681_s11 + $0x8] sm:$0xff] %v967_v61  ;;  %v1034_v10 = vadd.f32 %v967_v61, %v966_v58  ;;  %v1071_v11 = vmul.f32 %v967_v61, %v967_v61  ;;  %v653_v1 = vadd.f32 %v652_v7, %v1684_v56  ;;  %1001 = vst [vmem:[%s1681_s11 + $0x18] sm:$0xff] %v969_v0  ;;  %v741_v13 = vpop.f32.mrb[3].mxu1  ;;  %v960_v7 = vld [vmem:[%s1667_s8 + $0xd0] sm:$0xff] }
 0x184   : > { %v974_v14 = vadd.f32 %v942_v63, %v651_v5  ;;  %v740_v15 = vadd.f32 %v739_v9, %v1684_v56  ;;  %v742_v16 = vadd.f32 %v741_v13, %v1684_v56  ;;  %v1073_v20 = vmul.f32 %v969_v0, %v969_v0 }
 0x185   : > { %v1102_v17 = vadd.f32 %v1071_v11, %v1070_v4  ;;  %v1035_v18 = vadd.f32 %v1034_v10, %v968_v59  ;;  %v975_v19 = vadd.f32 %v943_v8, %v653_v1  ;;  %v656_v47 = vpop.f32.mrb[4].mxu0 }
 0x186   : > { %1006 = vst [vmem:[%s1681_s11 + $0x40] sm:$0xff] %v974_v14  ;;  %v1078_v22 = vmul.f32 %v974_v14, %v974_v14  ;;  %v976_v23 = vadd.f32 %v944_v12, %v740_v15  ;;  %v657_v25 = vadd.f32 %v656_v47, %v1688_v2  ;;  %v658_v26 = vpop.f32.mrb[5].mxu0  ;;  %v977_v27 = vadd.f32 %v945_v37, %v742_v16 }
 0x187   : > { %v1103_v28 = vadd.f32 %v1102_v17, %v1072_v38  ;;  %1007 = vst [vmem:[%s1681_s11 + $0x48] sm:$0xff] %v975_v19  ;;  %v1043_v30 = vadd.f32 %v975_v19, %v974_v14  ;;  %v1079_v60 = vmul.f32 %v975_v19, %v975_v19  ;;  %v1705_v31 = vadd.f32 %v1035_v18, %v969_v0  ;;  %v745_v33 = vpop.f32.mrb[4].mxu1  ;;  %v961_v14 = vld [vmem:[%s1667_s8 + $0xd8] sm:$0xff] }
 0x188   : > { %1008 = vst [vmem:[%s1681_s11 + $0x50] sm:$0xff] %v976_v23  ;;  %v1080_v35 = vmul.f32 %v976_v23, %v976_v23  ;;  %v659_v36 = vadd.f32 %v658_v26, %v1688_v2  ;;  %v982_v39 = vadd.f32 %v950_v21, %v657_v25  ;;  %1009 = vst [vmem:[%s1681_s11 + $0x58] sm:$0xff] %v977_v27  ;;  %v747_v3 = vpop.f32.mrb[5].mxu1  ;;  %v940_v21 = vld [vmem:[%s1667_s8 + $0x30] sm:$0xff] }
 0x189   : > { %v1081_v40 = vmul.f32 %v977_v27, %v977_v27  ;;  %v1111_v43 = vadd.f32 %v1079_v60, %v1078_v22  ;;  %v1714_v24 = vadd.f32 %v1103_v28, %v1073_v20  ;;  %v1044_v29 = vadd.f32 %v1043_v30, %v976_v23  ;;  %v662_v42 = vpop.f32.mrb[6].mxu0  ;;  %v938_v20 = vld [vmem:[%s1667_s8 + $0x20] sm:$0xff] }
 0x18a   : > { %v746_v45 = vadd.f32 %v745_v33, %v1688_v2  ;;  %v983_v49 = vadd.f32 %v951_v32, %v659_v36  ;;  %1014 = vst [vmem:[%s1681_s11 + $0x80] sm:$0xff] %v982_v39  ;;  %v1086_v50 = vmul.f32 %v982_v39, %v982_v39  ;;  %v748_v51 = vadd.f32 %v747_v3, %v1688_v2  ;;  %v664_v53 = vpop.f32.mrb[7].mxu0  ;;  %v939_v33 = vld [vmem:[%s1667_s8 + $0x28] sm:$0xff]  ;;  %v941_v3 = vld [vmem:[%s1667_s8 + $0x38] sm:$0xff] }
 0x18b   : > { %v663_v52 = vadd.f32 %v662_v42, %v1708_v34  ;;  %v1112_v55 = vadd.f32 %v1111_v43, %v1080_v35  ;;  %v1723_v57 = vadd.f32 %v1044_v29, %v977_v27  ;;  %v751_v59 = vpop.f32.mrb[6].mxu1  ;;  %v665_v61 = vadd.f32 %v664_v53, %v1708_v34  ;;  %v948_v53 = vld [vmem:[%s1667_s8 + $0x70] sm:$0xff] }
 0x18c   : > { %v984_v58 = vadd.f32 %v952_v41, %v746_v45  ;;  %1015 = vst [vmem:[%s1681_s11 + $0x88] sm:$0xff] %v983_v49  ;;  %v1052_v62 = vadd.f32 %v983_v49, %v982_v39  ;;  %v1087_v63 = vmul.f32 %v983_v49, %v983_v49  ;;  %v985_v0 = vadd.f32 %v953_v46, %v748_v51  ;;  %v753_v5 = vpop.f32.mrb[7].mxu1 }
 0x18d   : > { %v990_v4 = vadd.f32 %v958_v48, %v663_v52  ;;  %v1728_v8 = vadd.f32 %v1112_v55, %v1081_v40  ;;  %v991_v10 = vadd.f32 %v959_v54, %v665_v61  ;;  %v752_v11 = vadd.f32 %v751_v59, %v1708_v34  ;;  %v822_v38 = vpop.f32.mrb[8].mxu0  ;;  %v946_v48 = vld [vmem:[%s1667_s8 + $0x60] sm:$0xff]  ;;  %v947_v54 = vld [vmem:[%s1667_s8 + $0x68] sm:$0xff] }
 0x18e   : > { %1016 = vst [vmem:[%s1681_s11 + $0x90] sm:$0xff] %v984_v58  ;;  %v1088_v9 = vmul.f32 %v984_v58, %v984_v58  ;;  %v1120_v1 = vadd.f32 %v1087_v63, %v1086_v50  ;;  %v1053_v12 = vadd.f32 %v1052_v62, %v984_v58  ;;  %1017 = vst [vmem:[%s1681_s11 + $0x98] sm:$0xff] %v985_v0  ;;  %v824_v15 = vpop.f32.mrb[9].mxu0  ;;  %v954_v63 = vld [vmem:[%s1667_s8 + $0xa0] sm:$0xff] }
 0x18f   : > { %v1089_v13 = vmul.f32 %v985_v0, %v985_v0  ;;  %1022 = vst [vmem:[%s1681_s11 + $0xc0] sm:$0xff] %v990_v4  ;;  %v1094_v37 = vmul.f32 %v990_v4, %v990_v4  ;;  %1023 = vst [vmem:[%s1681_s11 + $0xc8] sm:$0xff] %v991_v10  ;;  %v1061_v16 = vadd.f32 %v991_v10, %v990_v4  ;;  %v911_v47 = vpop.f32.mrb[8].mxu1 }
 0x190   : > { %v1095_v17 = vmul.f32 %v991_v10, %v991_v10  ;;  %v754_v18 = vadd.f32 %v753_v5, %v1708_v34  ;;  %v992_v19 = vadd.f32 %v960_v7, %v752_v11  ;;  %v1121_v22 = vadd.f32 %v1120_v1, %v1088_v9  ;;  %v913_v27 = vpop.f32.mrb[9].mxu1  ;;  %v955_v9 = vld [vmem:[%s1667_s8 + $0xa8] sm:$0xff] }
 0x191   : > { %v1739_v23 = vadd.f32 %v1053_v12, %v985_v0  ;;  %v823_v25 = vadd.f32 %v822_v38, %v1669_v44  ;;  %v912_v26 = vadd.f32 %v911_v47, %v1669_v44  ;;  %v828_v35 = vpop.f32.mrb[10].mxu0  ;;  %v825_v41 = vadd.f32 %v824_v15, %v1669_v44 }
 0x192   : > { %v1129_v28 = vadd.f32 %v1095_v17, %v1094_v37  ;;  %v993_v30 = vadd.f32 %v961_v14, %v754_v18  ;;  %1024 = vst [vmem:[%s1681_s11 + $0xd0] sm:$0xff] %v992_v19  ;;  %v1062_v60 = vadd.f32 %v1061_v16, %v992_v19  ;;  %v1096_v32 = vmul.f32 %v992_v19, %v992_v19  ;;  %v830_v43 = vpop.f32.mrb[11].mxu0  ;;  %v956_v14 = vld [vmem:[%s1667_s8 + $0xb0] sm:$0xff]  ;;  %v957_v16 = vld [vmem:[%s1667_s8 + $0xb8] sm:$0xff] }
 0x193   : > { %v1745_v36 = vadd.f32 %v1121_v22, %v1089_v13  ;;  %v970_v39 = vadd.f32 %v938_v20, %v823_v25  ;;  %v1747_v40 = vadd.f32 %v940_v21, %v912_v26  ;;  %v914_v42 = vadd.f32 %v913_v27, %v1669_v44  ;;  %v917_v49 = vpop.f32.mrb[10].mxu1  ;;  %v963_v26 = vld [vmem:[%s1667_s8 + $0xe8] sm:$0xff] }
 0x194   : > { %1025 = vst [vmem:[%s1681_s11 + $0xd8] sm:$0xff] %v993_v30  ;;  %v1752_v29 = vadd.f32 %v1062_v60, %v993_v30  ;;  %v1097_v45 = vmul.f32 %v993_v30, %v993_v30  ;;  %v1130_v46 = vadd.f32 %v1129_v28, %v1096_v32  ;;  %v971_v51 = vadd.f32 %v939_v33, %v825_v41  ;;  %v919_v55 = vpop.f32.mrb[11].mxu1  ;;  %v964_v32 = vld [vmem:[%s1667_s8 + $0xf0] sm:$0xff] }
 0x195   : > { %1002 = vst [vmem:[%s1681_s11 + $0x20] sm:$0xff] %v970_v39  ;;  %v1037_v50 = vadd.f32 %v1705_v31, %v970_v39  ;;  %1004 = vst [vmem:[%s1681_s11 + $0x30] sm:$0xff] %v1747_v40  ;;  %v829_v52 = vadd.f32 %v828_v35, %v1684_v56  ;;  %v1765_v44 = vadd.f32 %v941_v3, %v914_v42  ;;  %v949_v31 = vld [vmem:[%s1667_s8 + $0x78] sm:$0xff]  ;;  %v834_v62 = vpop.f32.mrb[12].mxu0 }
 0x196   : > { %v1763_v58 = vadd.f32 %v1130_v46, %v1097_v45  ;;  %v918_v59 = vadd.f32 %v917_v49, %v1684_v56  ;;  %v831_v61 = vadd.f32 %v830_v43, %v1684_v56  ;;  %1003 = vst [vmem:[%s1681_s11 + $0x28] sm:$0xff] %v971_v51  ;;  %v920_v4 = vadd.f32 %v919_v55, %v1684_v56  ;;  %v836_v7 = vpop.f32.mrb[13].mxu0  ;;  %v965_v3 = vld [vmem:[%s1667_s8 + $0xf8] sm:$0xff] }
 0x197   : > { %v978_v0 = vadd.f32 %v946_v48, %v829_v52  ;;  %v835_v5 = vadd.f32 %v834_v62, %v1688_v2  ;;  %1005 = vst [vmem:[%s1681_s11 + $0x38] sm:$0xff] %v1765_v44  ;;  %v923_v38 = vpop.f32.mrb[12].mxu1  ;;  %v837_v1 = vadd.f32 %v836_v7, %v1688_v2  ;;  %v1038_v12 = vadd.f32 %v1037_v50, %v971_v51 }
 0x198   : > { %v1777_v10 = vadd.f32 %v948_v53, %v918_v59  ;;  %v979_v11 = vadd.f32 %v947_v54, %v831_v61  ;;  %v1782_v13 = vadd.f32 %v949_v31, %v920_v4  ;;  %v925_v15 = vpop.f32.mrb[13].mxu1  ;;  %v1074_v17 = vmul.f32 %v970_v39, %v970_v39 }
 0x199   : > { %1010 = vst [vmem:[%s1681_s11 + $0x60] sm:$0xff] %v978_v0  ;;  %v1046_v56 = vadd.f32 %v1723_v57, %v978_v0  ;;  %v986_v37 = vadd.f32 %v954_v63, %v835_v5  ;;  %v924_v18 = vadd.f32 %v923_v38, %v1688_v2  ;;  %v987_v19 = vadd.f32 %v955_v9, %v837_v1  ;;  %v840_v47 = vpop.f32.mrb[14].mxu0  ;;  %v962_v57 = vld [vmem:[%s1667_s8 + $0xe0] sm:$0xff] }
 0x19a   : > { %1012 = vst [vmem:[%s1681_s11 + $0x70] sm:$0xff] %v1777_v10  ;;  %1011 = vst [vmem:[%s1681_s11 + $0x68] sm:$0xff] %v979_v11  ;;  %v926_v20 = vadd.f32 %v925_v15, %v1688_v2  ;;  %v841_v22 = vadd.f32 %v840_v47, %v1708_v34  ;;  %v842_v25 = vpop.f32.mrb[15].mxu0  ;;  %v1039_v27 = vadd.f32 %v1038_v12, %v1747_v40  ;;  %v1030_v47 = vld [vmem:[%s1832_s14] sm:$0xff] }
 0x19b   : > { %1013 = vst [vmem:[%s1681_s11 + $0x78] sm:$0xff] %v1782_v13  ;;  %1018 = vst [vmem:[%s1681_s11 + $0xa0] sm:$0xff] %v986_v37  ;;  %v1055_v21 = vadd.f32 %v1739_v23, %v986_v37  ;;  %v1075_v28 = vmul.f32 %v971_v51, %v971_v51  ;;  %v988_v30 = vadd.f32 %v956_v14, %v924_v18  ;;  %v929_v60 = vpop.f32.mrb[14].mxu1 }
 0x19c   : > { %1019 = vst [vmem:[%s1681_s11 + $0xa8] sm:$0xff] %v987_v19  ;;  %v989_v2 = vadd.f32 %v957_v16, %v926_v20  ;;  %v843_v33 = vadd.f32 %v842_v25, %v1708_v34  ;;  %v1082_v35 = vmul.f32 %v978_v0, %v978_v0  ;;  %v994_v23 = vadd.f32 %v962_v57, %v841_v22  ;;  %v931_v41 = vpop.f32.mrb[15].mxu1  ;;  %v1031_v25 = vld [vmem:[%s1832_s14 + $0x8] sm:$0xff] }
 0x19d   : > { %v930_v39 = vadd.f32 %v929_v60, %v1708_v34  ;;  %v1040_v43 = vadd.f32 %v1039_v27, %v1765_v44  ;;  %v1090_v45 = vmul.f32 %v986_v37, %v986_v37  ;;  %1020 = vst [vmem:[%s1681_s11 + $0xb0] sm:$0xff] %v988_v30  ;;  %v932_v42 = vadd.f32 %v931_v41, %v1708_v34 }
 0x19e   : > { %1021 = vst [vmem:[%s1681_s11 + $0xb8] sm:$0xff] %v989_v2  ;;  %v995_v46 = vadd.f32 %v963_v26, %v843_v33  ;;  %v1105_v48 = vadd.f32 %v1714_v24, %v1074_v17  ;;  %v1083_v49 = vmul.f32 %v979_v11, %v979_v11  ;;  %1026 = vst [vmem:[%s1681_s11 + $0xe0] sm:$0xff] %v994_v23 }
 0x19f   : > { %v1064_v50 = vadd.f32 %v1752_v29, %v994_v23  ;;  %v996_v51 = vadd.f32 %v964_v32, %v930_v39  ;;  %1041 = vadd.xlane.f32.xlu0 %v1040_v43  ;;  %v1047_v52 = vadd.f32 %v1046_v56, %v979_v11  ;;  %v1091_v53 = vmul.f32 %v987_v19, %v987_v19 }
 0x1a0   : > { %1027 = vst [vmem:[%s1681_s11 + $0xe8] sm:$0xff] %v995_v46  ;;  %v997_v54 = vadd.f32 %v965_v3, %v932_v42  ;;  %v1076_v55 = vmul.f32 %v1747_v40, %v1747_v40  ;;  %v1106_v59 = vadd.f32 %v1105_v48, %v1075_v28  ;;  %v1098_v61 = vmul.f32 %v994_v23, %v994_v23  ;;  %v1033_v23 = vld [vmem:[%s1832_s14 + $0x18] sm:$0xff] }
 0x1a1   : > { %1028 = vst [vmem:[%s1681_s11 + $0xf0] sm:$0xff] %v996_v51  ;;  %v1077_v34 = vmul.f32 %v1765_v44, %v1765_v44  ;;  %v1048_v24 = vadd.f32 %v1047_v52, %v1777_v10  ;;  %v1114_v31 = vadd.f32 %v1728_v8, %v1082_v35  ;;  %v1099_v29 = vmul.f32 %v995_v46, %v995_v46 }
 0x1a2   : > { %1029 = vst [vmem:[%s1681_s11 + $0xf8] sm:$0xff] %v997_v54  ;;  %v1107_v62 = vadd.f32 %v1106_v59, %v1076_v55  ;;  %v1123_v63 = vadd.f32 %v1745_v36, %v1090_v45  ;;  %v1056_v0 = vadd.f32 %v1055_v21, %v987_v19  ;;  %v1084_v40 = vmul.f32 %v1777_v10, %v1777_v10 }
 0x1a3   : > { %v1049_v4 = vadd.f32 %v1048_v24, %v1782_v13  ;;  %v1115_v5 = vadd.f32 %v1114_v31, %v1083_v49  ;;  %v1065_v7 = vadd.f32 %v1064_v50, %v995_v46  ;;  %v1092_v11 = vmul.f32 %v988_v30, %v988_v30 }
 0x1a4   : > { %v1108_v9 = vadd.f32 %v1107_v62, %v1077_v34  ;;  %v1124_v44 = vadd.f32 %v1123_v63, %v1091_v53  ;;  %v1057_v38 = vadd.f32 %v1056_v0, %v988_v30  ;;  %v1085_v8 = vmul.f32 %v1782_v13, %v1782_v13  ;;  %v1032_v30 = vld [vmem:[%s1832_s14 + $0x10] sm:$0xff] }
 0x1a5   : > { %v1116_v1 = vadd.f32 %v1115_v5, %v1084_v40  ;;  %v1066_v12 = vadd.f32 %v1065_v7, %v996_v51  ;;  %v1132_v36 = vadd.f32 %v1763_v58, %v1098_v61  ;;  %v1093_v56 = vmul.f32 %v989_v2, %v989_v2 }
 0x1a6   : > { %1109 = vadd.xlane.f32.xlu1 %v1108_v9  ;;  %v1125_v37 = vadd.f32 %v1124_v44, %v1092_v11  ;;  %v1058_v14 = vadd.f32 %v1057_v38, %v989_v2  ;;  %v1100_v16 = vmul.f32 %v996_v51, %v996_v51  ;;  %v1101_v19 = vmul.f32 %v997_v54, %v997_v54 }
 0x1a7   : > { %v1117_v15 = vadd.f32 %v1116_v1, %v1085_v8  ;;  %v1067_v10 = vadd.f32 %v1066_v12, %v997_v54  ;;  %v1133_v17 = vadd.f32 %v1132_v36, %v1099_v29 }
 0x1a8   : > { %v1126_v18 = vadd.f32 %v1125_v37, %v1093_v56 }
 0x1a9   : > { %1118 = vadd.xlane.f32.xlu0 %v1117_v15  ;;  %v1134_v20 = vadd.f32 %v1133_v17, %v1100_v16 }
 0x1aa   : > { %1050 = vadd.xlane.f32.xlu1 %v1049_v4 }
 0x1ab   : > { %v1135_v58 = vadd.f32 %v1134_v20, %v1101_v19 }
 0x1ad   : > { %1059 = vadd.xlane.f32.xlu0 %v1058_v14 }
 0x1ae   : > { %1127 = vadd.xlane.f32.xlu1 %v1126_v18 }
 0x1b1   : > { %1068 = vadd.xlane.f32.xlu0 %v1067_v10 }
 0x1b5   : > { %1136 = vadd.xlane.f32.xlu0 %v1135_v58 }
 0x22c   : > { %v1042_v13 = vpop.xlane.xlu0 %1041 }
 0x233   : > { %v1110_v57 = vpop.xlane.xlu1 %1109 }
 0x234   : > { %v1139_v21 = vsel %vm1138_vm2, %v1042_v13, %v1110_v57 }
 0x235   : > { %v1143_v22 = vadd.f32 %v1139_v21, %v1030_v47 }
 0x236   : > { %v1119_v26 = vpop.xlane.xlu0 %1118 }
 0x237   : > { %1148 = vst.msk [vmem:[%s1832_s14] sm:$0xff] %vm364_vm1, %v1143_v22  ;;  %v1051_v6 = vpop.xlane.xlu1 %1050 }
 0x238   : > { %v1140_v27 = vsel %vm1138_vm2, %v1051_v6, %v1119_v26 }
 0x239   : > { %v1144_v28 = vadd.f32 %v1140_v27, %v1031_v25 }
 0x23a   : > { %v1060_v2 = vpop.xlane.xlu0 %1059 }
 0x23b   : > { %1149 = vst.msk [vmem:[%s1832_s14 + $0x8] sm:$0xff] %vm364_vm1, %v1144_v28  ;;  %v1128_v60 = vpop.xlane.xlu1 %1127 }
 0x23c   : > { %v1141_v32 = vsel %vm1138_vm2, %v1060_v2, %v1128_v60 }
 0x23d   : > { %v1145_v33 = vadd.f32 %v1141_v32, %v1032_v30 }
 0x23e   : > { %v1069_v35 = vpop.xlane.xlu0 %1068 }
 0x23f   : > { %1150 = vst.msk [vmem:[%s1832_s14 + $0x10] sm:$0xff] %vm364_vm1, %v1145_v33 }
 0x242   : > { %v1137_v39 = vpop.xlane.xlu0 %1136 }
 0x243   : > { %v1142_v41 = vsel %vm1138_vm2, %v1069_v35, %v1137_v39 }
 0x244   : > { %v1146_v3 = vadd.f32 %v1142_v41, %v1033_v23 }
 0x246   : > { %1151 = vst.msk [vmem:[%s1832_s14 + $0x18] sm:$0xff] %vm364_vm1, %v1146_v3 }
 0x247 PF: > { %s17_s23 = sadd.s32 1, %s1428_s23   ;;  %s1878_s21 = smov %s1424_s22 }
 0x248   : > { %p14_p5 = scmp.ge.s32.totalorder %s17_s23, 4   ;;  %s1879_s22 = smov %s1881_s24 }
 0x24a   :  { %16 = sbr.rel (!%p14_p5) target bundleno = 2 (0x2), region = 92 }

// kernel: pointcn_stack_forward.9
= control target key start
LH: loop header
LB: loop body
LE: loop exit
PB: predicated region body
PF: predicated region fallthrough
CT: control target
= control target key end

     0   :  { %s1256_s18 = smov 0   ;;  %s1258_s19 = smov 0   ;;  %s1574_s0 = inlined_call_operand.vmem [shape: f32[2,32,1024], index: 0, kind: input, shape index: {}]   ;;  %s1575_s1 = inlined_call_operand.vmem [shape: f32[2,32,1024], index: 1, kind: input, shape index: {}]   ;;  %s1576_s2 = inlined_call_operand.vmem [shape: f32[2,32,2], index: 2, kind: input, shape index: {}]   ;;  %s1577_s3 = inlined_call_operand.vmem [shape: f32[32,32], index: 3, kind: input, shape index: {}]   ;;  %s1578_s4 = inlined_call_operand.vmem [shape: f32[32,1], index: 4, kind: input, shape index: {}]   ;;  %s1579_s5 = inlined_call_operand.vmem [shape: f32[2,32,1024], index: 5, kind: output, shape index: {}]  }
   0x1   :  { %s1260_s20 = smov 0  }
   0x2 LB: > { %s27_s21 = sadd.s32 1, %s1217_s19  ;;  %p1102_p0 = scmp.ge.s32.totalorder %s1221_s20, 1  ;;  %s1221_s20 = sphi %s1260_s20, %s15_s20   ;;  %s1217_s19 = sphi %s1258_s19, %s1581_s19   ;;  %s1213_s18 = sphi %s1256_s18, %s1580_s18  }
   0x3   : > { %p29_p1 = scmp.ge.s32.totalorder %s27_s21, 2  ;;  %p235_p2 = scmp.lt.s32.totalorder %s1221_s20, 3 }
   0x5   : > { %s1583_s21 = smov (%p29_p1, %s27_s21), 0  ;;  %p236_p3 = pnand %p1102_p0, %p235_p2 }
   0x6   : > { %p286_p4 = scmp.lt.s32.totalorder (!%p236_p3), %s1213_s18, 1  ;;  %v1223_v0 = vmov (!%p236_p3), 1   ;;  %v1224_v1 = vmov (!%p236_p3), 0   ;;  %v1225_v6 = vmov (!%p236_p3), 0.0   ;;  %v492_v7 = vld [vmem:[%s1578_s4] sm:$0xff] (!%p236_p3)  ;;  %v493_v8 = vld [vmem:[%s1578_s4 + $0x8] sm:$0xff] (!%p236_p3) }
   0x7   : > { %239 = sbr.rel (%p236_p3) target bundleno = 418 (0x1a2), region = 40  ;;  %1193 = vset.pattern.permute.xlu1 (!%p236_p3), %v1223_v0  ;;  %1192 = vset.pattern.permute.xlu0 (!%p236_p3), %v1224_v1  ;;  %v494_v9 = vld [vmem:[%s1578_s4 + $0x10] sm:$0xff] (!%p236_p3)  ;;  %v495_v10 = vld [vmem:[%s1578_s4 + $0x18] sm:$0xff] (!%p236_p3)  ;;  %vm516_vm0 = vcmask (!%p236_p3), 261120  }
   0x8   : > { %593 = vmatprep.mubr.f32.mxu0 (!%p236_p3), %v1225_v6  ;;  %682 = vmatprep.mubr.f32.mxu1 (!%p236_p3), %v1225_v6 }
   0xe   : > { %s1585_s18 = smov (!%p286_p4, %s1213_s18), 1 }
   0xf   : > { %s1131_s22 = sshll.u32 %s1585_s18, 5  ;;  %s1295_s9 = sshll.u32 %s1585_s18, 8 }
  0x10   : > { %s309_s25 = scalar_lea.vmem %s1576_s2, %s1131_s22  ;;  %s1301_s12 = scalar_lea.vmem %s1574_s0, %s1295_s9 }
  0x11   : > { %v352_v2 = vld [vmem:[%s309_s25] sm:$0xff]  ;;  %v353_v3 = vld [vmem:[%s309_s25 + $0x8] sm:$0xff]  ;;  %v354_v4 = vld [vmem:[%s309_s25 + $0x10] sm:$0xff]  ;;  %s1453_s26 = scalar_lea.vmem %s1575_s1, %s1295_s9  ;;  %s1467_s29 = scalar_lea.vmem %s1579_s5, %s1295_s9 }
  0x12   : > { %409 = vperm.xlu1 %1193, %v352_v2   ;;  %358 = vperm.xlu0 %1192, %v352_v2   ;;  %v355_v5 = vld [vmem:[%s309_s25 + $0x18] sm:$0xff]  ;;  %v321_v11 = vld [vmem:[%s1301_s12 + $0x8] sm:$0xff]  ;;  %v320_v13 = vld [vmem:[%s1301_s12] sm:$0xff] }
  0x13   : > { %v323_v12 = vld [vmem:[%s1301_s12 + $0x18] sm:$0xff]  ;;  %v322_v14 = vld [vmem:[%s1301_s12 + $0x10] sm:$0xff]  ;;  %v325_v15 = vld [vmem:[%s1301_s12 + $0x28] sm:$0xff] }
  0x14   : > { %v327_v16 = vld [vmem:[%s1301_s12 + $0x38] sm:$0xff]  ;;  %v324_v17 = vld [vmem:[%s1301_s12 + $0x20] sm:$0xff]  ;;  %v326_v18 = vld [vmem:[%s1301_s12 + $0x30] sm:$0xff] }
  0x15   : > { %v329_v25 = vld [vmem:[%s1301_s12 + $0x48] sm:$0xff]  ;;  %v331_v26 = vld [vmem:[%s1301_s12 + $0x58] sm:$0xff]  ;;  %v328_v33 = vld [vmem:[%s1301_s12 + $0x40] sm:$0xff] }
  0x16   : > { %413 = vperm.xlu1 %1193, %v353_v3   ;;  %363 = vperm.xlu0 %1192, %v353_v3   ;;  %v330_v35 = vld [vmem:[%s1301_s12 + $0x50] sm:$0xff]  ;;  %v333_v39 = vld [vmem:[%s1301_s12 + $0x68] sm:$0xff]  ;;  %v335_v46 = vld [vmem:[%s1301_s12 + $0x78] sm:$0xff] }
  0x17   : > { %v337_v52 = vld [vmem:[%s1301_s12 + $0x88] sm:$0xff]  ;;  %v339_v53 = vld [vmem:[%s1301_s12 + $0x98] sm:$0xff]  ;;  %v336_v63 = vld [vmem:[%s1301_s12 + $0x80] sm:$0xff] }
  0x18   : > { %v345_v57 = vld [vmem:[%s1301_s12 + $0xc8] sm:$0xff]  ;;  %v347_v58 = vld [vmem:[%s1301_s12 + $0xd8] sm:$0xff] }
  0x1a   : > { %1194 = vset.pattern.permute.xlu1 %v1224_v1  ;;  %368 = vperm.xlu0 %1192, %v354_v4  }
  0x1b   : > { %373 = vperm.xlu1 %1194, %v355_v5  }
  0x1e   : > { %1195 = vset.pattern.permute.xlu0 %v1223_v0 }
  0x1f   : > { %1196 = vset.pattern.permute.xlu1 %v1223_v0  ;;  %417 = vperm.xlu0 %1195, %v354_v4   ;;  %v344_v0 = vld [vmem:[%s1301_s12 + $0xc0] sm:$0xff] }
  0x20   : > { %421 = vperm.xlu1 %1196, %v355_v5  }
  0x23   : > { %1198 = vset.pattern.permute.xlu0 %v1224_v1 }
  0x24   : > { %1197 = vset.pattern.permute.xlu1 %v1224_v1  ;;  %503 = vperm.xlu0 %1198, %v493_v8  }
  0x25   : > { %498 = vperm.xlu1 %1197, %v492_v7  }
  0x29   : > { %508 = vperm.xlu1 %1197, %v494_v9   ;;  %v338_v9 = vld [vmem:[%s1301_s12 + $0x90] sm:$0xff] }
  0x2d   : > { %513 = vperm.xlu1 %1197, %v495_v10   ;;  %v346_v10 = vld [vmem:[%s1301_s12 + $0xd0] sm:$0xff] }
  0x91   : > { %v410_v19 = vpop.permute.xlu1 %409  ;;  %v359_v20 = vpop.permute.xlu0 %358 }
  0x92   : > { %v377_v21 = vmul.f32 %v359_v20, %v321_v11  ;;  %v379_v22 = vmul.f32 %v359_v20, %v323_v12  ;;  %v376_v23 = vmul.f32 %v359_v20, %v320_v13  ;;  %v378_v24 = vmul.f32 %v359_v20, %v322_v14 }
  0x93   : > { %v381_v27 = vmul.f32 %v359_v20, %v325_v15  ;;  %v383_v28 = vmul.f32 %v359_v20, %v327_v16  ;;  %v380_v29 = vmul.f32 %v359_v20, %v324_v17  ;;  %v382_v30 = vmul.f32 %v359_v20, %v326_v18  ;;  %v332_v15 = vld [vmem:[%s1301_s12 + $0x60] sm:$0xff] }
  0x94   : > { %v425_v31 = vadd.f32 %v410_v19, %v377_v21  ;;  %v427_v32 = vadd.f32 %v410_v19, %v379_v22  ;;  %v424_v34 = vadd.f32 %v410_v19, %v376_v23  ;;  %v426_v36 = vadd.f32 %v410_v19, %v378_v24 }
  0x95   : > { %v1315_v37 = vpop.permute.xlu1 %413  ;;  %v1317_v38 = vpop.permute.xlu0 %363  ;;  %v1320_v40 = vadd.f32 %v410_v19, %v381_v27  ;;  %v1322_v41 = vadd.f32 %v410_v19, %v383_v28  ;;  %v1324_v42 = vadd.f32 %v410_v19, %v380_v29  ;;  %v1329_v47 = vadd.f32 %v410_v19, %v382_v30 }
  0x96   : > { %v385_v43 = vmul.f32 %v1317_v38, %v329_v25  ;;  %v457_v44 = vmax.f32 %v425_v31, 0.0  ;;  %v387_v45 = vmul.f32 %v1317_v38, %v331_v26  ;;  %v459_v48 = vmax.f32 %v427_v32, 0.0 }
  0x97   : > { %v384_v49 = vmul.f32 %v1317_v38, %v328_v33  ;;  %v456_v50 = vmax.f32 %v424_v34, 0.0  ;;  %v386_v51 = vmul.f32 %v1317_v38, %v330_v35  ;;  %v458_v56 = vmax.f32 %v426_v36, 0.0 }
  0x98   : > { %v433_v54 = vadd.f32 %v1315_v37, %v385_v43  ;;  %v435_v55 = vadd.f32 %v1315_v37, %v387_v45  ;;  %v389_v59 = vmul.f32 %v1317_v38, %v333_v39  ;;  %v461_v1 = vmax.f32 %v1320_v40, 0.0  ;;  %v334_v45 = vld [vmem:[%s1301_s12 + $0x70] sm:$0xff] }
  0x99   : > { %v1340_v60 = vpop.permute.xlu0 %368  ;;  %v432_v61 = vadd.f32 %v1315_v37, %v384_v49  ;;  %v434_v62 = vadd.f32 %v1315_v37, %v386_v51  ;;  %v391_v2 = vmul.f32 %v1317_v38, %v335_v46  ;;  %v463_v27 = vmax.f32 %v1322_v41, 0.0 }
  0x9a   : > { %v1348_v3 = vpop.permute.xlu1 %373  ;;  %v465_v4 = vmax.f32 %v433_v54, 0.0  ;;  %v467_v5 = vmax.f32 %v435_v55, 0.0  ;;  %v393_v7 = vmul.f32 %v1340_v60, %v337_v52  ;;  %v395_v8 = vmul.f32 %v1340_v60, %v339_v53  ;;  %v341_v54 = vld [vmem:[%s1301_s12 + $0xa8] sm:$0xff] }
  0x9b   : > { %v464_v11 = vmax.f32 %v432_v61, 0.0  ;;  %v466_v12 = vmax.f32 %v434_v62, 0.0  ;;  %v401_v13 = vmul.f32 %v1348_v3, %v345_v57  ;;  %v403_v14 = vmul.f32 %v1348_v3, %v347_v58  ;;  %v349_v55 = vld [vmem:[%s1301_s12 + $0xe8] sm:$0xff]  ;;  %v343_v61 = vld [vmem:[%s1301_s12 + $0xb8] sm:$0xff] }
  0x9c   : > { %v1133_v16 = vpack.c.bf16 %v465_v4, %v457_v44  ;;  %v1141_v17 = vpack.c.bf16 %v467_v5, %v459_v48  ;;  %v392_v18 = vmul.f32 %v1340_v60, %v336_v63  ;;  %v400_v19 = vmul.f32 %v1348_v3, %v344_v0  ;;  %v351_v62 = vld [vmem:[%s1301_s12 + $0xf8] sm:$0xff]  ;;  %v340_v5 = vld [vmem:[%s1301_s12 + $0xa0] sm:$0xff] }
  0x9d   : > { %v1135_v20 = vpack.c.bf16 %v464_v11, %v456_v50  ;;  %v1143_v21 = vpack.c.bf16 %v466_v12, %v458_v56  ;;  %v394_v22 = vmul.f32 %v1340_v60, %v338_v9  ;;  %v402_v23 = vmul.f32 %v1348_v3, %v346_v10  ;;  %v348_v10 = vld [vmem:[%s1301_s12 + $0xe0] sm:$0xff]  ;;  %v342_v11 = vld [vmem:[%s1301_s12 + $0xb0] sm:$0xff] }
  0x9e   : > { %v1361_v24 = vpop.permute.xlu0 %417  ;;  %1134 = vmatprep.subr.bf16.mxu0 %v1133_v16  ;;  %1142 = vmatprep.subr.bf16.mxu1 %v1141_v17  ;;  %v437_v25 = vadd.f32 %v1315_v37, %v389_v59  ;;  %v439_v26 = vadd.f32 %v1315_v37, %v391_v2  ;;  %v388_v28 = vmul.f32 %v1317_v38, %v332_v15  ;;  %v460_v33 = vmax.f32 %v1324_v42, 0.0 }
  0x9f   : > { %v1367_v29 = vpop.permute.xlu1 %421  ;;  %1136 = vmatpush1.bf16.msra.mxu0 %v1135_v20  ;;  %1144 = vmatpush1.bf16.msra.mxu1 %v1143_v21  ;;  %v441_v30 = vadd.f32 %v1361_v24, %v393_v7  ;;  %v443_v31 = vadd.f32 %v1361_v24, %v395_v8  ;;  %v440_v32 = vadd.f32 %v1361_v24, %v392_v18  ;;  %v462_v12 = vmax.f32 %v1329_v47, 0.0  ;;  %v350_v18 = vld [vmem:[%s1301_s12 + $0xf0] sm:$0xff] }
  0xa0   : > { %v449_v34 = vadd.f32 %v1367_v29, %v401_v13  ;;  %v451_v35 = vadd.f32 %v1367_v29, %v403_v14  ;;  %v448_v36 = vadd.f32 %v1367_v29, %v400_v19  ;;  %v442_v39 = vadd.f32 %v1361_v24, %v394_v22 }
  0xa1   : > { %v473_v40 = vmax.f32 %v441_v30, 0.0  ;;  %v475_v41 = vmax.f32 %v443_v31, 0.0  ;;  %v472_v43 = vmax.f32 %v440_v32, 0.0  ;;  %v450_v44 = vadd.f32 %v1367_v29, %v402_v23  ;;  %v489_v30 = vld [vmem:[%s1577_s3 + $0x8] sm:$0xff] }
  0xa2   : > { %v481_v46 = vmax.f32 %v449_v34, 0.0  ;;  %v483_v42 = vmax.f32 %v451_v35, 0.0  ;;  %v480_v48 = vmax.f32 %v448_v36, 0.0  ;;  %v474_v49 = vmax.f32 %v442_v39, 0.0 }
  0xa3   : > { %v482_v50 = vmax.f32 %v450_v44, 0.0  ;;  %v469_v51 = vmax.f32 %v437_v25, 0.0  ;;  %v471_v52 = vmax.f32 %v439_v26, 0.0  ;;  %v436_v53 = vadd.f32 %v1315_v37, %v388_v28 }
  0xa4   : > { %v1137_v56 = vpack.c.bf16 %v481_v46, %v473_v40  ;;  %v1145_v57 = vpack.c.bf16 %v483_v42, %v475_v41  ;;  %v1139_v58 = vpack.c.bf16 %v480_v48, %v472_v43  ;;  %v390_v59 = vmul.f32 %v1317_v38, %v334_v45  ;;  %v488_v38 = vld [vmem:[%s1577_s3] sm:$0xff]  ;;  %v490_v43 = vld [vmem:[%s1577_s3 + $0x10] sm:$0xff]  ;;  %v1455_v44 = vpop.permute.xlu1 %498 }
  0xa5   : > { %v1147_v63 = vpack.c.bf16 %v482_v50, %v474_v49  ;;  %v1149_v0 = vpack.c.bf16 %v469_v51, %v461_v1  ;;  %v1157_v2 = vpack.c.bf16 %v471_v52, %v463_v27  ;;  %v468_v4 = vmax.f32 %v436_v53, 0.0  ;;  %v885_v42 = vld [vmem:[%s1453_s26] sm:$0xff]  ;;  %v887_v48 = vld [vmem:[%s1453_s26 + $0x10] sm:$0xff]  ;;  %v886_v51 = vld [vmem:[%s1453_s26 + $0x8] sm:$0xff] }
  0xa6   : > { %1138 = vmatprep.subr.bf16.mxu0 %v1137_v56  ;;  %1146 = vmatprep.subr.bf16.mxu1 %v1145_v57  ;;  %v438_v7 = vadd.f32 %v1315_v37, %v390_v59  ;;  %v397_v8 = vmul.f32 %v1340_v60, %v341_v54  ;;  %v405_v9 = vmul.f32 %v1348_v3, %v349_v55  ;;  %v888_v53 = vld [vmem:[%s1453_s26 + $0x18] sm:$0xff]  ;;  %v1471_v56 = vpop.permute.xlu0 %503 }
  0xa7   : > { %1140 = vmatpush1.bf16.msra.mxu0 %v1139_v58  ;;  %1148 = vmatpush1.bf16.msra.mxu1 %v1147_v63  ;;  %v1151_v1 = vpack.c.bf16 %v468_v4, %v460_v33  ;;  %v399_v13 = vmul.f32 %v1340_v60, %v343_v61  ;;  %v407_v37 = vmul.f32 %v1348_v3, %v351_v62  ;;  %v893_v63 = vld [vmem:[%s1453_s26 + $0x40] sm:$0xff] }
  0xa8   : > { %1150 = vmatprep.subr.bf16.mxu0 %v1149_v0  ;;  %1158 = vmatprep.subr.bf16.mxu1 %v1157_v2  ;;  %v470_v14 = vmax.f32 %v438_v7, 0.0  ;;  %v445_v15 = vadd.f32 %v1361_v24, %v397_v8  ;;  %v453_v16 = vadd.f32 %v1367_v29, %v405_v9  ;;  %v396_v17 = vmul.f32 %v1340_v60, %v340_v5  ;;  %v1474_v0 = vpop.permute.xlu1 %508  ;;  %v895_v5 = vld [vmem:[%s1453_s26 + $0x50] sm:$0xff]  ;;  %v894_v8 = vld [vmem:[%s1453_s26 + $0x48] sm:$0xff] }
  0xa9   : > { %v447_v19 = vadd.f32 %v1361_v24, %v399_v13  ;;  %v455_v20 = vadd.f32 %v1367_v29, %v407_v37  ;;  %v404_v47 = vmul.f32 %v1348_v3, %v348_v10  ;;  %v398_v21 = vmul.f32 %v1340_v60, %v342_v11 }
  0xaa   : > { %1111 = vmatmul.mubr.msk.f32.vlgmr.msra.gmra.mrb[0].mxu0 %vm516_vm0, %v488_v38  ;;  %1115 = vmatmul.mubr.msk.f32.vlgmr.msra.gmra.mrb[0].mxu1 %vm516_vm0, %v488_v38  ;;  %v1159_v22 = vpack.c.bf16 %v470_v14, %v462_v12  ;;  %v477_v23 = vmax.f32 %v445_v15, 0.0  ;;  %v485_v25 = vmax.f32 %v453_v16, 0.0  ;;  %v444_v26 = vadd.f32 %v1361_v24, %v396_v17  ;;  %v901_v15 = vld [vmem:[%s1453_s26 + $0x80] sm:$0xff] }
  0xab   : > { %1152 = vmatpush1.bf16.msra.mxu0 %v1151_v1  ;;  %v479_v27 = vmax.f32 %v447_v19, 0.0  ;;  %v487_v28 = vmax.f32 %v455_v20, 0.0  ;;  %599 = vmatprep.mubr.f32.mxu0 %v1225_v6  ;;  %v452_v60 = vadd.f32 %v1367_v29, %v404_v47  ;;  %v406_v31 = vmul.f32 %v1348_v3, %v350_v18  ;;  %v902_v19 = vld [vmem:[%s1453_s26 + $0x88] sm:$0xff]  ;;  %v903_v47 = vld [vmem:[%s1453_s26 + $0x90] sm:$0xff] }
  0xac   : > { %1160 = vmatpush1.bf16.msra.mxu1 %v1159_v22  ;;  %v1153_v32 = vpack.c.bf16 %v485_v25, %v477_v23  ;;  %688 = vmatprep.mubr.f32.mxu1 %v1225_v6  ;;  %v476_v33 = vmax.f32 %v444_v26, 0.0  ;;  %v446_v34 = vadd.f32 %v1361_v24, %v398_v21  ;;  %v1495_v22 = vpop.permute.xlu1 %513 }
  0xad   : > { %v1161_v35 = vpack.c.bf16 %v487_v28, %v479_v27  ;;  %v484_v36 = vmax.f32 %v452_v60, 0.0  ;;  %v454_v39 = vadd.f32 %v1367_v29, %v406_v31  ;;  %v491_v29 = vld [vmem:[%s1577_s3 + $0x18] sm:$0xff]  ;;  %v909_v31 = vld [vmem:[%s1453_s26 + $0xc0] sm:$0xff] }
  0xae   : > { %1154 = vmatprep.subr.bf16.mxu0 %v1153_v32  ;;  %1112 = vmatmul.mubr.msk.f32.gmra.mrb[2].mxu0 %vm516_vm0, %v489_v30  ;;  %v478_v40 = vmax.f32 %v446_v34, 0.0  ;;  %v904_v27 = vld [vmem:[%s1453_s26 + $0x98] sm:$0xff] }
  0xaf   : > { %1162 = vmatprep.subr.bf16.mxu1 %v1161_v35  ;;  %1116 = vmatmul.mubr.msk.f32.gmra.mrb[2].mxu1 %vm516_vm0, %v489_v30  ;;  %v1155_v41 = vpack.c.bf16 %v484_v36, %v476_v33  ;;  %v486_v3 = vmax.f32 %v454_v39, 0.0  ;;  %v910_v35 = vld [vmem:[%s1453_s26 + $0xc8] sm:$0xff] }
  0xb0   : > { %605 = vmatprep.mubr.f32.mxu0 %v1225_v6  ;;  %694 = vmatprep.mubr.f32.mxu1 %v1225_v6 }
  0xb1   : > { %1156 = vmatpush1.bf16.msra.mxu0 %v1155_v41  ;;  %v1163_v24 = vpack.c.bf16 %v486_v3, %v478_v40  ;;  %v911_v40 = vld [vmem:[%s1453_s26 + $0xd0] sm:$0xff] }
  0xb2   : > { %1113 = vmatmul.mubr.msk.f32.gmra.mrb[4].mxu0 %vm516_vm0, %v490_v43 }
  0xb3   : > { %1164 = vmatpush1.bf16.msra.mxu1 %v1163_v24  ;;  %611 = vmatprep.mubr.f32.mxu0 %v1225_v6 }
  0xb4   : > { %1117 = vmatmul.mubr.msk.f32.gmra.mrb[4].mxu1 %vm516_vm0, %v490_v43 }
  0xb5   : > { %700 = vmatprep.mubr.f32.mxu1 %v1225_v6 }
  0xb6   : > { %1114 = vmatmul.mubr.msk.f32.gmra.mrb[6].mxu0 %vm516_vm0, %v491_v29 }
  0xb7   : > { %771 = vmatprep.mubr.f32.mxu0 %v1225_v6 }
  0xb8   : > { %1118 = vmatmul.mubr.msk.f32.gmra.mrb[6].mxu1 %vm516_vm0, %v491_v29 }
  0xb9   : > { %860 = vmatprep.mubr.f32.mxu1 %v1225_v6 }
  0xba   : > { %1119 = vmatmul.mubr.msk.f32.vlgmr.msra.gmra.mrb[8].mxu0 %vm516_vm0, %v488_v38 }
  0xbb   : > { %777 = vmatprep.mubr.f32.mxu0 %v1225_v6 }
  0xbc   : > { %1123 = vmatmul.mubr.msk.f32.vlgmr.msra.gmra.mrb[8].mxu1 %vm516_vm0, %v488_v38  ;;  %v896_v38 = vld [vmem:[%s1453_s26 + $0x58] sm:$0xff] }
  0xbd   : > { %866 = vmatprep.mubr.f32.mxu1 %v1225_v6 }
  0xbe   : > { %1120 = vmatmul.mubr.msk.f32.gmra.mrb[10].mxu0 %vm516_vm0, %v489_v30 }
  0xbf   : > { %783 = vmatprep.mubr.f32.mxu0 %v1225_v6 }
  0xc0   : > { %1124 = vmatmul.mubr.msk.f32.gmra.mrb[10].mxu1 %vm516_vm0, %v489_v30 }
  0xc1   : > { %872 = vmatprep.mubr.f32.mxu1 %v1225_v6 }
  0xc2   : > { %1121 = vmatmul.mubr.msk.f32.gmra.mrb[12].mxu0 %vm516_vm0, %v490_v43 }
  0xc3   : > { %789 = vmatprep.mubr.f32.mxu0 %v1225_v6 }
  0xc4   : > { %1125 = vmatmul.mubr.msk.f32.gmra.mrb[12].mxu1 %vm516_vm0, %v490_v43 }
  0xc5   : > { %878 = vmatprep.mubr.f32.mxu1 %v1225_v6 }
  0xc6   : > { %1122 = vmatmul.mubr.msk.f32.gmra.mrb[14].mxu0 %vm516_vm0, %v491_v29 }
  0xc8   : > { %1126 = vmatmul.mubr.msk.f32.gmra.mrb[14].mxu1 %vm516_vm0, %v491_v29  ;;  %v912_v29 = vld [vmem:[%s1453_s26 + $0xd8] sm:$0xff] }
 0x17d   : > { %v595_v45 = vpop.f32.mrb[0].mxu0  ;;  %v684_v46 = vpop.f32.mrb[0].mxu1 }
 0x17e   : > { %v596_v6 = vadd.f32 %v595_v45, %v1455_v44  ;;  %v685_v49 = vadd.f32 %v684_v46, %v1455_v44  ;;  %v597_v50 = vpop.f32.mrb[1].mxu0  ;;  %v686_v52 = vpop.f32.mrb[1].mxu1 }
 0x17f   : > { %v598_v54 = vadd.f32 %v597_v50, %v1455_v44  ;;  %v687_v55 = vadd.f32 %v686_v52, %v1455_v44 }
 0x180   : > { %v917_v57 = vadd.f32 %v885_v42, %v596_v6  ;;  %v919_v58 = vadd.f32 %v887_v48, %v685_v49  ;;  %v889_v48 = vld [vmem:[%s1453_s26 + $0x20] sm:$0xff] }
 0x181   : > { %v918_v59 = vadd.f32 %v886_v51, %v598_v54  ;;  %v920_v61 = vadd.f32 %v888_v53, %v687_v55  ;;  %v601_v62 = vpop.f32.mrb[2].mxu0  ;;  %v890_v51 = vld [vmem:[%s1453_s26 + $0x28] sm:$0xff]  ;;  %v891_v54 = vld [vmem:[%s1453_s26 + $0x30] sm:$0xff] }
 0x182   : > { %949 = vst [vmem:[%s1467_s29] sm:$0xff] %v917_v57  ;;  %951 = vst [vmem:[%s1467_s29 + $0x10] sm:$0xff] %v919_v58  ;;  %v690_v2 = vpop.f32.mrb[2].mxu1  ;;  %v602_v4 = vadd.f32 %v601_v62, %v1471_v56  ;;  %v603_v7 = vpop.f32.mrb[3].mxu0 }
 0x183   : > { %950 = vst [vmem:[%s1467_s29 + $0x8] sm:$0xff] %v918_v59  ;;  %952 = vst [vmem:[%s1467_s29 + $0x18] sm:$0xff] %v920_v61  ;;  %v691_v9 = vadd.f32 %v690_v2, %v1471_v56  ;;  %v604_v10 = vadd.f32 %v603_v7, %v1471_v56  ;;  %v692_v11 = vpop.f32.mrb[3].mxu1  ;;  %v892_v61 = vld [vmem:[%s1453_s26 + $0x38] sm:$0xff] }
 0x184   : > { %v925_v1 = vadd.f32 %v893_v63, %v602_v4  ;;  %v693_v12 = vadd.f32 %v692_v11, %v1471_v56  ;;  %v897_v4 = vld [vmem:[%s1453_s26 + $0x60] sm:$0xff] }
 0x185   : > { %v927_v13 = vadd.f32 %v895_v5, %v691_v9  ;;  %v926_v37 = vadd.f32 %v894_v8, %v604_v10  ;;  %v607_v14 = vpop.f32.mrb[4].mxu0  ;;  %v898_v9 = vld [vmem:[%s1453_s26 + $0x68] sm:$0xff] }
 0x186   : > { %957 = vst [vmem:[%s1467_s29 + $0x40] sm:$0xff] %v925_v1  ;;  %v928_v16 = vadd.f32 %v896_v38, %v693_v12  ;;  %v608_v17 = vadd.f32 %v607_v14, %v1474_v0  ;;  %v609_v18 = vpop.f32.mrb[5].mxu0  ;;  %v899_v38 = vld [vmem:[%s1453_s26 + $0x70] sm:$0xff] }
 0x187   : > { %959 = vst [vmem:[%s1467_s29 + $0x50] sm:$0xff] %v927_v13  ;;  %958 = vst [vmem:[%s1467_s29 + $0x48] sm:$0xff] %v926_v37  ;;  %v696_v20 = vpop.f32.mrb[4].mxu1  ;;  %v610_v21 = vadd.f32 %v609_v18, %v1474_v0  ;;  %v900_v37 = vld [vmem:[%s1453_s26 + $0x78] sm:$0xff] }
 0x188   : > { %960 = vst [vmem:[%s1467_s29 + $0x58] sm:$0xff] %v928_v16  ;;  %v697_v23 = vadd.f32 %v696_v20, %v1474_v0  ;;  %v933_v25 = vadd.f32 %v901_v15, %v608_v17  ;;  %v698_v26 = vpop.f32.mrb[5].mxu1  ;;  %v905_v17 = vld [vmem:[%s1453_s26 + $0xa0] sm:$0xff] }
 0x189   : > { %v934_v28 = vadd.f32 %v902_v19, %v610_v21  ;;  %v699_v30 = vadd.f32 %v698_v26, %v1474_v0  ;;  %v613_v60 = vpop.f32.mrb[6].mxu0 }
 0x18a   : > { %v935_v32 = vadd.f32 %v903_v47, %v697_v23  ;;  %965 = vst [vmem:[%s1467_s29 + $0x80] sm:$0xff] %v933_v25  ;;  %v614_v33 = vadd.f32 %v613_v60, %v1495_v22  ;;  %v615_v34 = vpop.f32.mrb[7].mxu0  ;;  %v906_v47 = vld [vmem:[%s1453_s26 + $0xa8] sm:$0xff]  ;;  %v907_v25 = vld [vmem:[%s1453_s26 + $0xb0] sm:$0xff] }
 0x18b   : > { %966 = vst [vmem:[%s1467_s29 + $0x88] sm:$0xff] %v934_v28  ;;  %v936_v36 = vadd.f32 %v904_v27, %v699_v30  ;;  %v702_v39 = vpop.f32.mrb[6].mxu1  ;;  %v616_v41 = vadd.f32 %v615_v34, %v1495_v22  ;;  %v908_v30 = vld [vmem:[%s1453_s26 + $0xb8] sm:$0xff] }
 0x18c   : > { %967 = vst [vmem:[%s1467_s29 + $0x90] sm:$0xff] %v935_v32  ;;  %v703_v3 = vadd.f32 %v702_v39, %v1495_v22  ;;  %v941_v43 = vadd.f32 %v909_v31, %v614_v33  ;;  %v704_v24 = vpop.f32.mrb[7].mxu1  ;;  %v913_v33 = vld [vmem:[%s1453_s26 + $0xe0] sm:$0xff]  ;;  %v914_v39 = vld [vmem:[%s1453_s26 + $0xe8] sm:$0xff] }
 0x18d   : > { %968 = vst [vmem:[%s1467_s29 + $0x98] sm:$0xff] %v936_v36  ;;  %v942_v45 = vadd.f32 %v910_v35, %v616_v41  ;;  %v705_v46 = vadd.f32 %v704_v24, %v1495_v22  ;;  %v773_v42 = vpop.f32.mrb[8].mxu0 }
 0x18e   : > { %v943_v6 = vadd.f32 %v911_v40, %v703_v3  ;;  %973 = vst [vmem:[%s1467_s29 + $0xc0] sm:$0xff] %v941_v43  ;;  %v774_v49 = vadd.f32 %v773_v42, %v1455_v44  ;;  %v775_v50 = vpop.f32.mrb[9].mxu0  ;;  %v915_v3 = vld [vmem:[%s1453_s26 + $0xf0] sm:$0xff] }
 0x18f   : > { %974 = vst [vmem:[%s1467_s29 + $0xc8] sm:$0xff] %v942_v45  ;;  %v944_v52 = vadd.f32 %v912_v29, %v705_v46  ;;  %v862_v53 = vpop.f32.mrb[8].mxu1  ;;  %v776_v55 = vadd.f32 %v775_v50, %v1455_v44  ;;  %v916_v45 = vld [vmem:[%s1453_s26 + $0xf8] sm:$0xff] }
 0x190   : > { %975 = vst [vmem:[%s1467_s29 + $0xd0] sm:$0xff] %v943_v6  ;;  %v921_v57 = vadd.f32 %v889_v48, %v774_v49  ;;  %v863_v58 = vadd.f32 %v862_v53, %v1455_v44  ;;  %v864_v59 = vpop.f32.mrb[9].mxu1 }
 0x191   : > { %976 = vst [vmem:[%s1467_s29 + $0xd8] sm:$0xff] %v944_v52  ;;  %v922_v62 = vadd.f32 %v890_v51, %v776_v55  ;;  %v865_v63 = vadd.f32 %v864_v59, %v1455_v44  ;;  %v779_v2 = vpop.f32.mrb[10].mxu0 }
 0x192   : > { %953 = vst [vmem:[%s1467_s29 + $0x20] sm:$0xff] %v921_v57  ;;  %v923_v5 = vadd.f32 %v891_v54, %v863_v58  ;;  %v780_v7 = vadd.f32 %v779_v2, %v1471_v56  ;;  %v781_v8 = vpop.f32.mrb[11].mxu0 }
 0x193   : > { %954 = vst [vmem:[%s1467_s29 + $0x28] sm:$0xff] %v922_v62  ;;  %v924_v10 = vadd.f32 %v892_v61, %v865_v63  ;;  %v868_v11 = vpop.f32.mrb[10].mxu1  ;;  %v782_v1 = vadd.f32 %v781_v8, %v1471_v56 }
 0x194   : > { %955 = vst [vmem:[%s1467_s29 + $0x30] sm:$0xff] %v923_v5  ;;  %v929_v44 = vadd.f32 %v897_v4, %v780_v7  ;;  %v869_v12 = vadd.f32 %v868_v11, %v1471_v56  ;;  %v870_v13 = vpop.f32.mrb[11].mxu1 }
 0x195   : > { %956 = vst [vmem:[%s1467_s29 + $0x38] sm:$0xff] %v924_v10  ;;  %v930_v14 = vadd.f32 %v898_v9, %v782_v1  ;;  %v871_v15 = vadd.f32 %v870_v13, %v1471_v56  ;;  %v785_v16 = vpop.f32.mrb[12].mxu0 }
 0x196   : > { %961 = vst [vmem:[%s1467_s29 + $0x60] sm:$0xff] %v929_v44  ;;  %v931_v18 = vadd.f32 %v899_v38, %v869_v12  ;;  %v786_v19 = vadd.f32 %v785_v16, %v1474_v0  ;;  %v787_v20 = vpop.f32.mrb[13].mxu0 }
 0x197   : > { %962 = vst [vmem:[%s1467_s29 + $0x68] sm:$0xff] %v930_v14  ;;  %v932_v21 = vadd.f32 %v900_v37, %v871_v15  ;;  %v874_v23 = vpop.f32.mrb[12].mxu1  ;;  %v788_v26 = vadd.f32 %v787_v20, %v1474_v0 }
 0x198   : > { %963 = vst [vmem:[%s1467_s29 + $0x70] sm:$0xff] %v931_v18  ;;  %v937_v56 = vadd.f32 %v905_v17, %v786_v19  ;;  %v875_v27 = vadd.f32 %v874_v23, %v1474_v0  ;;  %v876_v28 = vpop.f32.mrb[13].mxu1 }
 0x199   : > { %964 = vst [vmem:[%s1467_s29 + $0x78] sm:$0xff] %v932_v21  ;;  %v938_v60 = vadd.f32 %v906_v47, %v788_v26  ;;  %v877_v31 = vadd.f32 %v876_v28, %v1474_v0  ;;  %v791_v32 = vpop.f32.mrb[14].mxu0 }
 0x19a   : > { %969 = vst [vmem:[%s1467_s29 + $0xa0] sm:$0xff] %v937_v56  ;;  %v939_v34 = vadd.f32 %v907_v25, %v875_v27  ;;  %v792_v35 = vadd.f32 %v791_v32, %v1495_v22  ;;  %v793_v36 = vpop.f32.mrb[15].mxu0 }
 0x19b   : > { %970 = vst [vmem:[%s1467_s29 + $0xa8] sm:$0xff] %v938_v60  ;;  %v940_v40 = vadd.f32 %v908_v30, %v877_v31  ;;  %v880_v41 = vpop.f32.mrb[14].mxu1  ;;  %v794_v0 = vadd.f32 %v793_v36, %v1495_v22 }
 0x19c   : > { %971 = vst [vmem:[%s1467_s29 + $0xb0] sm:$0xff] %v939_v34  ;;  %v945_v43 = vadd.f32 %v913_v33, %v792_v35  ;;  %v881_v24 = vadd.f32 %v880_v41, %v1495_v22  ;;  %v882_v29 = vpop.f32.mrb[15].mxu1 }
 0x19d   : > { %972 = vst [vmem:[%s1467_s29 + $0xb8] sm:$0xff] %v940_v40  ;;  %v946_v46 = vadd.f32 %v914_v39, %v794_v0  ;;  %v883_v42 = vadd.f32 %v882_v29, %v1495_v22 }
 0x19e   : > { %977 = vst [vmem:[%s1467_s29 + $0xe0] sm:$0xff] %v945_v43  ;;  %v947_v48 = vadd.f32 %v915_v3, %v881_v24 }
 0x19f   : > { %978 = vst [vmem:[%s1467_s29 + $0xe8] sm:$0xff] %v946_v46  ;;  %v948_v6 = vadd.f32 %v916_v45, %v883_v42 }
 0x1a0   : > { %979 = vst [vmem:[%s1467_s29 + $0xf0] sm:$0xff] %v947_v48 }
 0x1a1   : > { %980 = vst [vmem:[%s1467_s29 + $0xf8] sm:$0xff] %v948_v6 }
 0x1a2 PF: > { %s15_s20 = sadd.s32 1, %s1221_s20   ;;  %s1580_s18 = smov %s1217_s19 }
 0x1a3   : > { %p12_p5 = scmp.ge.s32.totalorder %s15_s20, 4   ;;  %s1581_s19 = smov %s1583_s21 }
 0x1a5   :  { %14 = sbr.rel (!%p12_p5) target bundleno = 2 (0x2), region = 76 }

</bundles_post_ra>
